<compile_context>
chip_gen: v7x
topology: tpu7x:2x2x1
jax: 0.10.0
libtpu: 0.0.40
codegen_flags: <defaults>
</compile_context>

<pallas_src>
import jax
import jax.numpy as jnp
from jax import lax
from jax.experimental import pallas as pl
from jax.experimental.pallas import tpu as pltpu


# --------------------------------------------------------------------------- #
# Kernel
# --------------------------------------------------------------------------- #
def _bottleneck_kernel(x_ref, xt_ref, xb_ref, w1_ref, w2_ref, w3_ref,
                       b1_ref, b2_ref, b3_ref, o_ref):
    """One (batch_block, h_tile) output slab per grid step.  NHWC, bf16 in/out.

    x_ref  : (NB, TH, W, Cin) bf16  rows owned by this step (also the residual)
    xt_ref : (NB, 1,  W, Cin) bf16  halo row above (index clamped at the border)
    xb_ref : (NB, 1,  W, Cin) bf16  halo row below (index clamped at the border)
    w1_ref : (Cin, P)  bf16   conv1 weight, bn1 scale folded in
    w2_ref : (3P, 3P)  bf16   conv2 weight: rows (kx, cin), cols (ky, cout),
                              bn2 scale folded in
    w3_ref : (P, Cout) bf16   conv3 weight, bn3 scale folded in
    b*_ref : (1, C)    f32    folded BN biases
    o_ref  : (NB, TH, W, Cin) bf16
    """
    NB, TH, W, Cin = x_ref.shape
    P = w1_ref.shape[1]
    h_idx = pl.program_id(1)
    n_h = pl.num_programs(1)

    w1 = w1_ref[...]
    b1 = b1_ref[...]

    def conv1(x4):                       # (NB, R, W, Cin) -> (NB, R, W, P) f32
        r = x4.shape[1]
        t = jnp.dot(x4.reshape(NB * r * W, Cin), w1,
                    preferred_element_type=jnp.float32)
        return jnp.maximum(t + b1, 0.0).reshape(NB, r, W, P)

    # ---- conv1 (1x1) + bn1 + relu; halo rows recomputed.  ZeroPad2d(1) pads
    # ---- the *post-relu* feature map, so halo rows at the image border are 0.
    h1_mid = conv1(x_ref[...])
    h1_top = jnp.where(h_idx == 0, 0.0, conv1(xt_ref[...]))
    h1_bot = jnp.where(h_idx == n_h - 1, 0.0, conv1(xb_ref[...]))
    h1 = jnp.concatenate([h1_top, h1_mid, h1_bot], axis=1).astype(jnp.bfloat16)

    # ---- conv2 (3x3, stride 1, zero pad 1): one fused MXU matmul ------------
    zcol = jnp.zeros((NB, TH + 2, 1, P), jnp.bfloat16)
    left = jnp.concatenate([zcol, h1[:, :, :-1, :]], axis=2)     # h1[:, :, x-1]
    right = jnp.concatenate([h1[:, :, 1:, :], zcol], axis=2)     # h1[:, :, x+1]
    packed = jnp.concatenate([left, h1, right], axis=-1)         # (NB,TH+2,W,3P)
    packed = packed.reshape(NB * (TH + 2) * W, 3 * P)
    t = jnp.dot(packed, w2_ref[...], preferred_element_type=jnp.float32)
    t = t.reshape(NB, TH + 2, W, 3 * P)
    # Combine the ky taps by row-shifted adds over the extended slab:
    #   out[y] = t_ky0[y] + t_ky1[y+1] + t_ky2[y+2]   (extended-row coords).
    acc = (t[:, 0:TH, :, 0:P]
           + t[:, 1:TH + 1, :, P:2 * P]
           + t[:, 2:TH + 2, :, 2 * P:3 * P])

    # ---- bn2 (bias only; scale folded) + relu
    h2 = jnp.maximum(acc.reshape(NB * TH * W, P) + b2_ref[...], 0.0)

    # ---- conv3 (1x1) + bn3, residual add (identity path), relu
    h3 = jnp.dot(h2.astype(jnp.bfloat16), w3_ref[...],
                 preferred_element_type=jnp.float32) + b3_ref[...]
    res = x_ref[...].reshape(NB * TH * W, Cin).astype(jnp.float32)
    out = jnp.maximum(h3 + res, 0.0)
    o_ref[...] = out.reshape(NB, TH, W, Cin).astype(o_ref.dtype)


# --------------------------------------------------------------------------- #
# Wrapper-side packing / sizing helpers (one-time glue, negligible cost)
# --------------------------------------------------------------------------- #
def w2_from_torch_oihw(w_oihw):
    """PyTorch conv2 weight (O, I, kH, kW) -> (ky, kx, cin, cout)."""
    return jnp.transpose(w_oihw, (2, 3, 1, 0))


def pack_bottleneck_params(w1, w2, w3, s1, b1, s2, b2, s3, b3):
    """Fold BN scales into the conv weights at f32, then cast to bf16.

    Layouts: w1 (Cin, P), w2 (ky, kx, cin, cout) = (3, 3, P, P), w3 (P, Cout).
    """
    Cin, P = w1.shape
    Cout = w3.shape[1]
    assert w2.shape == (3, 3, P, P)
    w1f = (w1 * s1[None, :]).astype(jnp.bfloat16)
    w2s = w2 * s2[None, None, None, :]
    # (ky, kx, ci, co) -> rows (kx, ci) along K, cols (ky, co) along N.
    w2f = jnp.transpose(w2s, (1, 2, 0, 3)).reshape(3 * P, 3 * P).astype(jnp.bfloat16)
    w3f = (w3 * s3[None, :]).astype(jnp.bfloat16)
    return (w1f, w2f, w3f,
            b1.reshape(1, P).astype(jnp.float32),
            b2.reshape(1, P).astype(jnp.float32),
            b3.reshape(1, Cout).astype(jnp.float32))


def _vmem_limit_bytes():
    """Generation-dependent scoped-VMEM budget (bigger on v5e/v6e, tight on v7x)."""
    cap = None
    try:
        cap = getattr(pltpu.get_tpu_info(), "vmem_capacity_bytes", None)
    except Exception:
        cap = None
    if not cap:
        cap = 64 * 1024 * 1024          # conservative fallback (v7x per-core VMEM)
    return int(min(cap // 2, 100 * 1024 * 1024))


def _auto_h_tile(H, W, Cin, P, NB, vmem_limit):
    """Largest divisor of H whose per-step working set fits the VMEM budget."""
    def step_bytes(th):
        rows = NB * th * W
        ext = NB * (th + 2) * W
        return (2 * 2 * rows * Cin * 2          # x in + out blocks, bf16, double-buffered
                + 2 * 2 * 2 * NB * W * Cin * 2  # halo row blocks
                + ext * P * 2                   # h1 (bf16)
                + ext * 3 * P * 2               # packed (bf16)
                + ext * 3 * P * 4               # conv2 matmul result (f32)
                + rows * P * 4                  # h2 (f32)
                + rows * Cin * 4)               # conv3 result (f32)
    budget = vmem_limit // 2                    # headroom for weights / spills
    for th in sorted((d for d in range(1, H + 1) if H % d == 0), reverse=True):
        if step_bytes(th) <= budget:
            return th
    return 1


# --------------------------------------------------------------------------- #
# Forward pass (NHWC end-to-end, bf16 activations)
# --------------------------------------------------------------------------- #
def bottleneck_forward_nhwc(x, packed_params, *, h_tile=None, batch_block=1):
    """x: (N, H, W, Cin) bf16 (or castable).  Returns (N, H, W, Cin) bf16."""
    w1f, w2f, w3f, b1, b2, b3 = packed_params
    N, H, W, Cin = x.shape
    Cin_w, P = w1f.shape
    Cout = w3f.shape[1]
    assert Cin == Cin_w, "input channels must match conv1"
    assert Cout == Cin, "downsample=None requires planes*expansion == inplanes"

    x = x.astype(jnp.bfloat16)

    vmem_limit = _vmem_limit_bytes()
    NB = int(batch_block)
    assert N % NB == 0, "batch_block must divide N"
    TH = int(h_tile) if h_tile is not None else _auto_h_tile(H, W, Cin, P, NB, vmem_limit)
    assert H % TH == 0, "h_tile must divide H"

    def cspec(shape):
        return pl.BlockSpec(shape, lambda n, h: (0,) * len(shape))

    grid_spec = pltpu.PrefetchScalarGridSpec(
        num_scalar_prefetch=0,
        grid=(N // NB, H // TH),
        in_specs=[
            # rows owned by this step (conv1 + residual)
            pl.BlockSpec((NB, TH, W, Cin), lambda n, h: (n, h, 0, 0)),
            # 1-row halos; block size 1 along H => index_map returns a row index
            pl.BlockSpec((NB, 1, W, Cin),
                         lambda n, h: (n, jnp.maximum(h * TH - 1, 0), 0, 0)),
            pl.BlockSpec((NB, 1, W, Cin),
                         lambda n, h: (n, jnp.minimum((h + 1) * TH, H - 1), 0, 0)),
            cspec((Cin, P)),
            cspec((3 * P, 3 * P)),
            cspec((P, Cout)),
            cspec((1, P)), cspec((1, P)), cspec((1, Cout)),
        ],
        out_specs=pl.BlockSpec((NB, TH, W, Cin), lambda n, h: (n, h, 0, 0)),
    )

    return pl.pallas_call(
        _bottleneck_kernel,
        out_shape=jax.ShapeDtypeStruct((N, H, W, Cin), jnp.bfloat16),
        grid_spec=grid_spec,
        compiler_params=pltpu.CompilerParams(
            dimension_semantics=("parallel", "parallel"),
            vmem_limit_bytes=vmem_limit,
        ),
    )(x, x, x, w1f, w2f, w3f, b1, b2, b3)


# --------------------------------------------------------------------------- #
# Plain-JAX reference (same numerics policy: folded f32 scales, bf16 weights
# and activations between layers, f32 accumulation).
# --------------------------------------------------------------------------- #
def ref_forward_nhwc(x_bf16, w1, w2, w3, s1, b1, s2, b2, s3, b3):
    f32 = jnp.float32
    dn = ('NHWC', 'HWIO', 'NHWC')
    w1f = (w1 * s1[None, :])[None, None].astype(jnp.bfloat16)     # (1,1,Cin,P)
    w2f = (w2 * s2[None, None, None, :]).astype(jnp.bfloat16)     # (3,3,P,P) HWIO
    w3f = (w3 * s3[None, :])[None, None].astype(jnp.bfloat16)     # (1,1,P,Cout)

    h = lax.conv_general_dilated(x_bf16, w1f, (1, 1), 'VALID',
                                 dimension_numbers=dn, preferred_element_type=f32)
    h = jnp.maximum(h + b1, 0.0)
    h = lax.conv_general_dilated(h.astype(jnp.bfloat16), w2f, (1, 1),
                                 ((1, 1), (1, 1)), dimension_numbers=dn,
                                 preferred_element_type=f32)
    h = jnp.maximum(h + b2, 0.0)
    h = lax.conv_general_dilated(h.astype(jnp.bfloat16), w3f, (1, 1), 'VALID',
                                 dimension_numbers=dn, preferred_element_type=f32)
    h = h + b3
    return jnp.maximum(h + x_bf16.astype(f32), 0.0).astype(jnp.bfloat16)


# --------------------------------------------------------------------------- #
if __name__ == "__main__":
    key = jax.random.PRNGKey(0)
    N, H, W = 2, 16, 16
    planes = 4
    expansion = 4
    inplanes = planes * expansion      # downsample=None => residual channels match

    ks = jax.random.split(key, 16)
    # NHWC activations, cast once to bf16 at the block boundary.
    x = jax.random.normal(ks[0], (N, H, W, inplanes), jnp.float32).astype(jnp.bfloat16)

    # Conv weights in the layouts the kernel consumes:
    #   w1: (Cin, planes)             1x1 conv
    #   w2: (ky, kx, cin, cout)       3x3 conv (PyTorch OIHW -> w2_from_torch_oihw)
    #   w3: (planes, planes*4)        1x1 expansion conv
    w1 = 0.2 * jax.random.normal(ks[1], (inplanes, planes), jnp.float32)
    w2 = 0.2 * jax.random.normal(ks[2], (3, 3, planes, planes), jnp.float32)
    w3 = 0.2 * jax.random.normal(ks[3], (planes, planes * expansion), jnp.float32)

    eps = 1e-5

    def bn_affine(kg, kb, km, kv, c):
        gamma = 1.0 + 0.1 * jax.random.normal(kg, (c,), jnp.float32)
        beta = 0.1 * jax.random.normal(kb, (c,), jnp.float32)
        mean = 0.1 * jax.random.normal(km, (c,), jnp.float32)
        var = jax.nn.softplus(jax.random.normal(kv, (c,), jnp.float32)) + 0.5
        scale = gamma / jnp.sqrt(var + eps)
        bias = beta - mean * scale
        return scale, bias

    s1, b1 = bn_affine(ks[4], ks[5], ks[6], ks[7], planes)
    s2, b2 = bn_affine(ks[8], ks[9], ks[10], ks[11], planes)
    s3, b3 = bn_affine(ks[12], ks[13], ks[14], ks[15], planes * expansion)

    packed = pack_bottleneck_params(w1, w2, w3, s1, b1, s2, b2, s3, b3)
    ref = ref_forward_nhwc(x, w1, w2, w3, s1, b1, s2, b2, s3, b3)
    ref_f32 = ref.astype(jnp.float32)

    # Run 1: explicit H tiling (exercises the 1-row halo path, grid = (2, 2)).
    out1 = jax.block_until_ready(bottleneck_forward_nhwc(x, packed, h_tile=8))
    # Run 2: auto h_tile + 2 images per grid step (multi-image blocking path).
    out2 = jax.block_until_ready(bottleneck_forward_nhwc(x, packed, batch_block=2))

    for out in (out1, out2):
        assert out.shape == (N, H, W, inplanes) and out.dtype == jnp.bfloat16
        of = out.astype(jnp.float32)
        max_err = float(jnp.max(jnp.abs(of - ref_f32)))
        assert jnp.allclose(of, ref_f32, atol=2e-2, rtol=2e-2), max_err

    print("KERNEL_OK")
</pallas_src>

<mosaic_0001>
module attributes {stable_mosaic.version = 11 : i64} {
  func.func @_bottleneck_kernel(%arg0: i32, %arg1: i32, %arg2: memref<1x8x16x16xbf16, #tpu.memory_space<vmem>>, %arg3: memref<1x1x16x16xbf16, #tpu.memory_space<vmem>>, %arg4: memref<1x1x16x16xbf16, #tpu.memory_space<vmem>>, %arg5: memref<16x4xbf16, #tpu.memory_space<vmem>>, %arg6: memref<12x12xbf16, #tpu.memory_space<vmem>>, %arg7: memref<4x16xbf16, #tpu.memory_space<vmem>>, %arg8: memref<1x4xf32, #tpu.memory_space<vmem>>, %arg9: memref<1x4xf32, #tpu.memory_space<vmem>>, %arg10: memref<1x16xf32, #tpu.memory_space<vmem>>, %arg11: memref<1x8x16x16xbf16, #tpu.memory_space<vmem>>) attributes {dimension_semantics = [#tpu.dimension_semantics<parallel>, #tpu.dimension_semantics<parallel>], iteration_bounds = array<i64: 2, 2>, scalar_prefetch = 0 : i64, scratch_operands = 0 : i64, tpu.core_type = #tpu.core_type<tc>, window_params = [{transform_indices = @transform_0, window_bounds = array<i64: 1, 8, 16, 16>}, {transform_indices = @transform_1, window_bounds = array<i64: 1, 1, 16, 16>}, {transform_indices = @transform_2, window_bounds = array<i64: 1, 1, 16, 16>}, {pipeline_mode = #tpu.pipeline_mode<synchronous>, transform_indices = @transform_3, window_bounds = array<i64: 16, 4>}, {pipeline_mode = #tpu.pipeline_mode<synchronous>, transform_indices = @transform_4, window_bounds = array<i64: 12, 12>}, {pipeline_mode = #tpu.pipeline_mode<synchronous>, transform_indices = @transform_5, window_bounds = array<i64: 4, 16>}, {pipeline_mode = #tpu.pipeline_mode<synchronous>, transform_indices = @transform_6, window_bounds = array<i64: 1, 4>}, {pipeline_mode = #tpu.pipeline_mode<synchronous>, transform_indices = @transform_7, window_bounds = array<i64: 1, 4>}, {pipeline_mode = #tpu.pipeline_mode<synchronous>, transform_indices = @transform_8, window_bounds = array<i64: 1, 16>}, {transform_indices = @transform_9, window_bounds = array<i64: 1, 8, 16, 16>}]} {
    %c0 = arith.constant 0 : index
    %c0_0 = arith.constant 0 : index
    %0 = vector.load %arg5[%c0, %c0_0] : memref<16x4xbf16, #tpu.memory_space<vmem>>, vector<16x4xbf16>
    %c0_1 = arith.constant 0 : index
    %c0_2 = arith.constant 0 : index
    %1 = vector.load %arg8[%c0_1, %c0_2] : memref<1x4xf32, #tpu.memory_space<vmem>>, vector<1x4xf32>
    %c0_3 = arith.constant 0 : index
    %c0_4 = arith.constant 0 : index
    %c0_5 = arith.constant 0 : index
    %c0_6 = arith.constant 0 : index
    %2 = vector.load %arg2[%c0_3, %c0_4, %c0_5, %c0_6] : memref<1x8x16x16xbf16, #tpu.memory_space<vmem>>, vector<1x8x16x16xbf16>
    %3 = vector.shape_cast %2 : vector<1x8x16x16xbf16> to vector<128x16xbf16>
    %cst = arith.constant dense<0.000000e+00> : vector<128x4xf32>
    %4 = tpu.matmul %3, %0, %cst {dimension_numbers = #tpu.dot_dimension_numbers<[1], [0], [0], [1], [0, 0, 1, 1], [], []>} : vector<128x16xbf16>, vector<16x4xbf16>, vector<128x4xf32> -> vector<128x4xf32>
    %5 = vector.broadcast %1 : vector<1x4xf32> to vector<128x4xf32>
    %6 = arith.addf %4, %5 : vector<128x4xf32>
    %cst_7 = arith.constant 0.000000e+00 : f32
    %7 = vector.broadcast %cst_7 : f32 to vector<128x4xf32>
    %8 = arith.maximumf %6, %7 : vector<128x4xf32>
    %9 = vector.shape_cast %8 : vector<128x4xf32> to vector<1x8x16x4xf32>
    %c0_i32 = arith.constant 0 : i32
    %10 = arith.cmpi eq, %arg1, %c0_i32 : i32
    %c0_8 = arith.constant 0 : index
    %c0_9 = arith.constant 0 : index
    %c0_10 = arith.constant 0 : index
    %c0_11 = arith.constant 0 : index
    %11 = vector.load %arg3[%c0_8, %c0_9, %c0_10, %c0_11] : memref<1x1x16x16xbf16, #tpu.memory_space<vmem>>, vector<1x1x16x16xbf16>
    %12 = vector.shape_cast %11 : vector<1x1x16x16xbf16> to vector<16x16xbf16>
    %cst_12 = arith.constant dense<0.000000e+00> : vector<16x4xf32>
    %13 = tpu.matmul %12, %0, %cst_12 {dimension_numbers = #tpu.dot_dimension_numbers<[1], [0], [0], [1], [0, 0, 1, 1], [], []>} : vector<16x16xbf16>, vector<16x4xbf16>, vector<16x4xf32> -> vector<16x4xf32>
    %14 = vector.broadcast %1 : vector<1x4xf32> to vector<16x4xf32>
    %15 = arith.addf %13, %14 : vector<16x4xf32>
    %cst_13 = arith.constant 0.000000e+00 : f32
    %16 = vector.broadcast %cst_13 : f32 to vector<16x4xf32>
    %17 = arith.maximumf %15, %16 : vector<16x4xf32>
    %18 = vector.shape_cast %17 : vector<16x4xf32> to vector<1x1x16x4xf32>
    %cst_14 = arith.constant 0.000000e+00 : f32
    %19 = vector.broadcast %cst_14 : f32 to vector<1x1x16x4xf32>
    %20 = arith.select %10, %19, %18 : vector<1x1x16x4xf32>
    %c1_i32 = arith.constant 1 : i32
    %21 = arith.cmpi eq, %arg1, %c1_i32 : i32
    %c0_15 = arith.constant 0 : index
    %c0_16 = arith.constant 0 : index
    %c0_17 = arith.constant 0 : index
    %c0_18 = arith.constant 0 : index
    %22 = vector.load %arg4[%c0_15, %c0_16, %c0_17, %c0_18] : memref<1x1x16x16xbf16, #tpu.memory_space<vmem>>, vector<1x1x16x16xbf16>
    %23 = vector.shape_cast %22 : vector<1x1x16x16xbf16> to vector<16x16xbf16>
    %cst_19 = arith.constant dense<0.000000e+00> : vector<16x4xf32>
    %24 = tpu.matmul %23, %0, %cst_19 {dimension_numbers = #tpu.dot_dimension_numbers<[1], [0], [0], [1], [0, 0, 1, 1], [], []>} : vector<16x16xbf16>, vector<16x4xbf16>, vector<16x4xf32> -> vector<16x4xf32>
    %25 = vector.broadcast %1 : vector<1x4xf32> to vector<16x4xf32>
    %26 = arith.addf %24, %25 : vector<16x4xf32>
    %cst_20 = arith.constant 0.000000e+00 : f32
    %27 = vector.broadcast %cst_20 : f32 to vector<16x4xf32>
    %28 = arith.maximumf %26, %27 : vector<16x4xf32>
    %29 = vector.shape_cast %28 : vector<16x4xf32> to vector<1x1x16x4xf32>
    %cst_21 = arith.constant 0.000000e+00 : f32
    %30 = vector.broadcast %cst_21 : f32 to vector<1x1x16x4xf32>
    %31 = arith.select %21, %30, %29 : vector<1x1x16x4xf32>
    %32 = tpu.concatenate %20, %9, %31 in 1 : vector<1x1x16x4xf32>, vector<1x8x16x4xf32>, vector<1x1x16x4xf32> -> vector<1x10x16x4xf32>
    %33 = arith.truncf %32 : vector<1x10x16x4xf32> to vector<1x10x16x4xbf16>
    %cst_22 = arith.constant 0.000000e+00 : bf16
    %34 = vector.broadcast %cst_22 : bf16 to vector<1x10x1x4xbf16>
    %35 = vector.extract_strided_slice %33 {offsets = [0, 0, 0, 0], sizes = [1, 10, 15, 4], strides = [1, 1, 1, 1]} : vector<1x10x16x4xbf16> to vector<1x10x15x4xbf16>
    %36 = tpu.concatenate %34, %35 in 2 : vector<1x10x1x4xbf16>, vector<1x10x15x4xbf16> -> vector<1x10x16x4xbf16>
    %37 = vector.extract_strided_slice %33 {offsets = [0, 0, 1, 0], sizes = [1, 10, 15, 4], strides = [1, 1, 1, 1]} : vector<1x10x16x4xbf16> to vector<1x10x15x4xbf16>
    %38 = tpu.concatenate %37, %34 in 2 : vector<1x10x15x4xbf16>, vector<1x10x1x4xbf16> -> vector<1x10x16x4xbf16>
    %39 = tpu.concatenate %36, %33, %38 in 3 : vector<1x10x16x4xbf16>, vector<1x10x16x4xbf16>, vector<1x10x16x4xbf16> -> vector<1x10x16x12xbf16>
    %40 = vector.shape_cast %39 : vector<1x10x16x12xbf16> to vector<160x12xbf16>
    %c0_23 = arith.constant 0 : index
    %c0_24 = arith.constant 0 : index
    %41 = vector.load %arg6[%c0_23, %c0_24] : memref<12x12xbf16, #tpu.memory_space<vmem>>, vector<12x12xbf16>
    %cst_25 = arith.constant dense<0.000000e+00> : vector<160x12xf32>
    %42 = tpu.matmul %40, %41, %cst_25 {dimension_numbers = #tpu.dot_dimension_numbers<[1], [0], [0], [1], [0, 0, 1, 1], [], []>} : vector<160x12xbf16>, vector<12x12xbf16>, vector<160x12xf32> -> vector<160x12xf32>
    %43 = vector.shape_cast %42 : vector<160x12xf32> to vector<1x10x16x12xf32>
    %44 = vector.extract_strided_slice %43 {offsets = [0, 0, 0, 0], sizes = [1, 8, 16, 4], strides = [1, 1, 1, 1]} : vector<1x10x16x12xf32> to vector<1x8x16x4xf32>
    %45 = vector.extract_strided_slice %43 {offsets = [0, 1, 0, 4], sizes = [1, 8, 16, 4], strides = [1, 1, 1, 1]} : vector<1x10x16x12xf32> to vector<1x8x16x4xf32>
    %46 = arith.addf %44, %45 : vector<1x8x16x4xf32>
    %47 = vector.extract_strided_slice %43 {offsets = [0, 2, 0, 8], sizes = [1, 8, 16, 4], strides = [1, 1, 1, 1]} : vector<1x10x16x12xf32> to vector<1x8x16x4xf32>
    %48 = arith.addf %46, %47 : vector<1x8x16x4xf32>
    %49 = vector.shape_cast %48 : vector<1x8x16x4xf32> to vector<128x4xf32>
    %c0_26 = arith.constant 0 : index
    %c0_27 = arith.constant 0 : index
    %50 = vector.load %arg9[%c0_26, %c0_27] : memref<1x4xf32, #tpu.memory_space<vmem>>, vector<1x4xf32>
    %51 = vector.broadcast %50 : vector<1x4xf32> to vector<128x4xf32>
    %52 = arith.addf %49, %51 : vector<128x4xf32>
    %cst_28 = arith.constant 0.000000e+00 : f32
    %53 = vector.broadcast %cst_28 : f32 to vector<128x4xf32>
    %54 = arith.maximumf %52, %53 : vector<128x4xf32>
    %55 = arith.truncf %54 : vector<128x4xf32> to vector<128x4xbf16>
    %c0_29 = arith.constant 0 : index
    %c0_30 = arith.constant 0 : index
    %56 = vector.load %arg7[%c0_29, %c0_30] : memref<4x16xbf16, #tpu.memory_space<vmem>>, vector<4x16xbf16>
    %cst_31 = arith.constant dense<0.000000e+00> : vector<128x16xf32>
    %57 = tpu.matmul %55, %56, %cst_31 {dimension_numbers = #tpu.dot_dimension_numbers<[1], [0], [0], [1], [0, 0, 1, 1], [], []>} : vector<128x4xbf16>, vector<4x16xbf16>, vector<128x16xf32> -> vector<128x16xf32>
    %c0_32 = arith.constant 0 : index
    %c0_33 = arith.constant 0 : index
    %58 = vector.load %arg10[%c0_32, %c0_33] : memref<1x16xf32, #tpu.memory_space<vmem>>, vector<1x16xf32>
    %59 = vector.broadcast %58 : vector<1x16xf32> to vector<128x16xf32>
    %60 = arith.addf %57, %59 : vector<128x16xf32>
    %c0_34 = arith.constant 0 : index
    %c0_35 = arith.constant 0 : index
    %c0_36 = arith.constant 0 : index
    %c0_37 = arith.constant 0 : index
    %61 = vector.load %arg2[%c0_34, %c0_35, %c0_36, %c0_37] : memref<1x8x16x16xbf16, #tpu.memory_space<vmem>>, vector<1x8x16x16xbf16>
    %62 = vector.shape_cast %61 : vector<1x8x16x16xbf16> to vector<128x16xbf16>
    %63 = arith.extf %62 : vector<128x16xbf16> to vector<128x16xf32>
    %64 = arith.addf %60, %63 : vector<128x16xf32>
    %cst_38 = arith.constant 0.000000e+00 : f32
    %65 = vector.broadcast %cst_38 : f32 to vector<128x16xf32>
    %66 = arith.maximumf %64, %65 : vector<128x16xf32>
    %67 = vector.shape_cast %66 : vector<128x16xf32> to vector<1x8x16x16xf32>
    %68 = arith.truncf %67 : vector<1x8x16x16xf32> to vector<1x8x16x16xbf16>
    %c0_39 = arith.constant 0 : index
    %c0_40 = arith.constant 0 : index
    %c0_41 = arith.constant 0 : index
    %c0_42 = arith.constant 0 : index
    %69 = vector.load %arg11[%c0_39, %c0_40, %c0_41, %c0_42] : memref<1x8x16x16xbf16, #tpu.memory_space<vmem>>, vector<1x8x16x16xbf16>
    tpu.vector_store %arg11[%c0_39, %c0_40, %c0_41, %c0_42], %68 {strides = array<i32>} : memref<1x8x16x16xbf16, #tpu.memory_space<vmem>>, vector<1x8x16x16xbf16>,
    return
  }
  func.func @transform_0(%arg0: i32, %arg1: i32) -> (i32, i32, i32, i32) {
    %c0_i32 = arith.constant 0 : i32
    %c0_i32_0 = arith.constant 0 : i32
    %c0_i32_1 = arith.constant 0 : i32
    return %arg0, %arg1, %c0_i32, %c0_i32_0 : i32, i32, i32, i32
  }
  func.func @transform_1(%arg0: i32, %arg1: i32) -> (i32, i32, i32, i32) {
    %c8_i32 = arith.constant 8 : i32
    %0 = arith.muli %arg1, %c8_i32 : i32
    %c1_i32 = arith.constant 1 : i32
    %1 = arith.subi %0, %c1_i32 : i32
    %c0_i32 = arith.constant 0 : i32
    %2 = arith.maxsi %1, %c0_i32 : i32
    %c0_i32_0 = arith.constant 0 : i32
    %c0_i32_1 = arith.constant 0 : i32
    %c0_i32_2 = arith.constant 0 : i32
    return %arg0, %2, %c0_i32_0, %c0_i32_1 : i32, i32, i32, i32
  }
  func.func @transform_2(%arg0: i32, %arg1: i32) -> (i32, i32, i32, i32) {
    %c1_i32 = arith.constant 1 : i32
    %0 = arith.addi %arg1, %c1_i32 : i32
    %c8_i32 = arith.constant 8 : i32
    %1 = arith.muli %0, %c8_i32 : i32
    %c15_i32 = arith.constant 15 : i32
    %2 = arith.minsi %1, %c15_i32 : i32
    %c0_i32 = arith.constant 0 : i32
    %c0_i32_0 = arith.constant 0 : i32
    %c0_i32_1 = arith.constant 0 : i32
    return %arg0, %2, %c0_i32, %c0_i32_0 : i32, i32, i32, i32
  }
  func.func @transform_3(%arg0: i32, %arg1: i32) -> (i32, i32) {
    %c0_i32 = arith.constant 0 : i32
    %c0_i32_0 = arith.constant 0 : i32
    %c0_i32_1 = arith.constant 0 : i32
    return %c0_i32, %c0_i32_0 : i32, i32
  }
  func.func @transform_4(%arg0: i32, %arg1: i32) -> (i32, i32) {
    %c0_i32 = arith.constant 0 : i32
    %c0_i32_0 = arith.constant 0 : i32
    %c0_i32_1 = arith.constant 0 : i32
    return %c0_i32, %c0_i32_0 : i32, i32
  }
  func.func @transform_5(%arg0: i32, %arg1: i32) -> (i32, i32) {
    %c0_i32 = arith.constant 0 : i32
    %c0_i32_0 = arith.constant 0 : i32
    %c0_i32_1 = arith.constant 0 : i32
    return %c0_i32, %c0_i32_0 : i32, i32
  }
  func.func @transform_6(%arg0: i32, %arg1: i32) -> (i32, i32) {
    %c0_i32 = arith.constant 0 : i32
    %c0_i32_0 = arith.constant 0 : i32
    %c0_i32_1 = arith.constant 0 : i32
    return %c0_i32, %c0_i32_0 : i32, i32
  }
  func.func @transform_7(%arg0: i32, %arg1: i32) -> (i32, i32) {
    %c0_i32 = arith.constant 0 : i32
    %c0_i32_0 = arith.constant 0 : i32
    %c0_i32_1 = arith.constant 0 : i32
    return %c0_i32, %c0_i32_0 : i32, i32
  }
  func.func @transform_8(%arg0: i32, %arg1: i32) -> (i32, i32) {
    %c0_i32 = arith.constant 0 : i32
    %c0_i32_0 = arith.constant 0 : i32
    %c0_i32_1 = arith.constant 0 : i32
    return %c0_i32, %c0_i32_0 : i32, i32
  }
  func.func @transform_9(%arg0: i32, %arg1: i32) -> (i32, i32, i32, i32) {
    %c0_i32 = arith.constant 0 : i32
    %c0_i32_0 = arith.constant 0 : i32
    %c0_i32_1 = arith.constant 0 : i32
    return %arg0, %arg1, %c0_i32, %c0_i32_0 : i32, i32, i32, i32
  }
}

</mosaic_0001>

<bundles_post_ra>
// kernel: tpu_custom_call.1
= control target key start
LH: loop header
LB: loop body
LE: loop exit
PB: predicated region body
PF: predicated region fallthrough
CT: control target
= control target key end

     0   :  { %s3444_s0 = inlined_call_operand.hbm [shape: bf16[2,16,16,16], index: 0, kind: input, shape index: {}]   ;;  %s3445_s1 = inlined_call_operand.hbm [shape: bf16[2,16,16,16], index: 1, kind: input, shape index: {}]   ;;  %s3446_s2 = inlined_call_operand.hbm [shape: bf16[2,16,16,16], index: 2, kind: input, shape index: {}]   ;;  %s3447_s3 = inlined_call_operand.vmem [shape: bf16[16,4], index: 3, kind: input, shape index: {}]   ;;  %s3448_s4 = inlined_call_operand.vmem [shape: bf16[12,12], index: 4, kind: input, shape index: {}]   ;;  %s3449_s5 = inlined_call_operand.vmem [shape: bf16[4,16], index: 5, kind: input, shape index: {}]   ;;  %s3450_s6 = inlined_call_operand.vmem [shape: f32[1,4], index: 6, kind: input, shape index: {}]   ;;  %s3451_s7 = inlined_call_operand.vmem [shape: f32[1,4], index: 7, kind: input, shape index: {}]   ;;  %s3452_s8 = inlined_call_operand.vmem [shape: f32[1,16], index: 8, kind: input, shape index: {}]   ;;  %s3453_s9 = inlined_call_operand.hbm [shape: bf16[2,16,16,16], index: 9, kind: output, shape index: {}]  }
   0x1   :  { %3477 = sst [smem:[#allocation25_spill]] %s3444_s0 }
   0x2   :  { %3478 = sst [smem:[#allocation26_spill]] %s3445_s1 }
   0x3   :  { %3479 = sst [smem:[#allocation27_spill]] %s3446_s2 }
   0x4   :  { %3480 = sst [smem:[#allocation28_spill]] %s3447_s3 }
   0x5   :  { %3481 = sst [smem:[#allocation29_spill]] %s3448_s4 }
   0x6   :  { %3482 = sst [smem:[#allocation30_spill]] %s3449_s5 }
   0x7   :  { %3483 = sst [smem:[#allocation31_spill]] %s3450_s6 }
   0x8   :  { %3484 = sst [smem:[#allocation32_spill]] %s3451_s7 }
   0x9   :  { %3485 = sst [smem:[#allocation33_spill]] %s3452_s8 }
   0xa   :  { %3486 = sst [smem:[#allocation34_spill]] %s3453_s9 }
   0xb   :  { %14 = vsyncpa [#allocation3], 0 }
   0xc   :  { %16 = vsyncpa [#allocation3 + $0x1], 0 }
   0xd   :  { %17 = vsyncpa [#allocation6], 0 }
   0xe   :  { %19 = vsyncpa [#allocation6 + $0x1], 0 }
   0xf   :  { %20 = vsyncpa [#allocation4], 0 }
  0x10   :  { %22 = vsyncpa [#allocation4 + $0x1], 0  ;;  %s2533_s30 = smov 0   ;;  %s2535_s10 = smov 0  }
  0x11   :  { %s2537_s11 = smov 0   ;;  %s2539_s12 = smov 0  }
  0x12   :  { %s2541_s13 = smov 0   ;;  %s2543_s14 = smov 0  }
  0x13   :  { %s2545_s15 = smov 0   ;;  %s2547_s16 = smov 0  }
  0x14   :  { %s2549_s17 = smov 0   ;;  %s2551_s18 = smov 0  }
  0x15   :  { %s2553_s19 = smov 0   ;;  %s2555_s20 = smov 0  }
  0x16   :  { %s2557_s21 = smov 0   ;;  %s2559_s22 = smov 0  }
  0x17 LB: > { %3487 = sst [smem:[#allocation13_spill]] %s2432_s13  ;;  %s2604_s23 = sadd.s32 4294967295, %s2468_s22   ;;  %s2468_s22 = sphi %s2559_s22, %s28_s22   ;;  %s2464_s21 = sphi %s2557_s21, %s3558_s21   ;;  %s2460_s20 = sphi %s2555_s20, %s3557_s20   ;;  %s2456_s19 = sphi %s2553_s19, %s3556_s19   ;;  %s2452_s18 = sphi %s2551_s18, %s3555_s18   ;;  %s2448_s17 = sphi %s2549_s17, %s3554_s17   ;;  %s2444_s16 = sphi %s2547_s16, %s3565_s16   ;;  %s2440_s15 = sphi %s2545_s15, %s3564_s15   ;;  %s2436_s14 = sphi %s2543_s14, %s3563_s14   ;;  %s2432_s13 = sphi %s2541_s13, %s3562_s13   ;;  %s2428_s12 = sphi %s2539_s12, %s3551_s12   ;;  %s2424_s11 = sphi %s2537_s11, %s3561_s11   ;;  %s2420_s10 = sphi %s2535_s10, %s3560_s10   ;;  %s2416_s30 = sphi %s2533_s30, %s3559_s30  }
  0x18   : > { %3488 = sst [smem:[#allocation14_spill]] %s2448_s17  ;;  %s37_s24 = sadd.s32 1, %s2460_s20 }
  0x19   : > { %3489 = sst [smem:[#allocation15_spill]] %s2452_s18  ;;  %p38_p0 = scmp.ge.s32.totalorder %s37_s24, 2 }
  0x1a   : > { %3490 = sst [smem:[#allocation16_spill]] %s2456_s19  ;;  %s40_s25 = sadd.s32 1, %s2464_s21 }
  0x1b   : > { %3491 = sst [smem:[#allocation17_spill]] %s2460_s20  ;;  %p3465_p1 = scmp.eq.s32.totalorder %s2468_s22, 0 }
  0x1c   : > { %3492 = sst [smem:[#allocation18_spill]] %s2464_s21  ;;  %p3464_p2 = scmp.eq.s32.totalorder %s2604_s23, 0 }
  0x1d   : > { %s3567_s24 = smov (%p38_p0, %s37_s24), 0  ;;  %s3569_s25 = smov (!%p38_p0, %s40_s25), %s2464_s21 }
  0x1e   : > { %3493 = sst [smem:[#allocation19_spill]] %s3567_s24  ;;  %s45_s26 = ssub.s32 %s2460_s20, %s3567_s24 }
  0x1f   : > { %s1833_s27 = sshll.u32 %s2460_s20, 3  ;;  %p42_p3 = scmp.ge.s32.totalorder %s3569_s25, 2 }
  0x20   : > { %s1834_s28 = sadd.s32 4294967295, %s1833_s27  ;;  %s1835_s29 = sshll.u32 %s3567_s24, 3 }
  0x21   : > { %p74_p4 = scmp.gt.s32.totalorder %s1834_s28, 0  ;;  %s3571_s25 = smov (%p42_p3, %s3569_s25), 0 }
  0x22   : > { %3494 = sst [smem:[#allocation20_spill]] %s3571_s25  ;;  %s2621_s9 = ssub.s32 %s2464_s21, %s3571_s25 }
  0x23   : > { %s3573_s28 = smov (!%p74_p4, %s1834_s28), 0  ;;  %3495 = sst [smem:[#allocation21_spill]] %s2621_s9 }
  0x24   : > { %s1836_s19 = sadd.s32 4294967295, %s1835_s29  ;;  %s2624_s8 = sor.u32 %s45_s26, %s2621_s9 }
  0x25   : > { %p78_p5 = scmp.gt.s32.totalorder %s1836_s19, 0  ;;  %s85_s7 = sadd.s32 1, %s2436_s14 }
  0x26   : > { %p92_p7 = scmp.ne.s32.totalorder %s2436_s14, %s2432_s13  ;;  %p98_p8 = scmp.ne.s32.totalorder %s2432_s13, %s2428_s12 }
  0x27   : > { %s3575_s19 = smov (!%p78_p5, %s1836_s19), 0  ;;  %s2632_s25 = sadd.s32 8, %s1833_s27 }
  0x28   : > { %s81_s24 = ssub.s32 %s3573_s28, %s3575_s19  ;;  %p2637_p9 = por %p92_p7, %p3465_p1 }
  0x29   : > { %s82_s5 = sor.u32 %s81_s24, %s2621_s9  ;;  %p2643_p11 = por %p98_p8, %p3464_p2 }
  0x2a   : > { %p83_p10 = scmp.eq.s32.totalorder %s82_s5, 0  ;;  %s2648_s12 = sadd.s32 8, %s1835_s29 }
  0x2b   : > { %s3497_s6 = scalar_select %p2643_p11, 1, 0 }
  0x2c   : > { %s2651_s19 = scalar_select %p83_p10, %s2436_s14, %s85_s7  }
  0x2d   : > { %3498 = sst [smem:[#allocation22_spill]] %s3497_s6  ;;  %p3463_p0 = scmp.lt.s32.totalorder %s2468_s22, 4 }
  0x2e   : > { %3499 = sst [smem:[#allocation23_spill]] %s2651_s19  ;;  %s2656_s24 = sshll.u32 %s2464_s21, 5 }
  0x2f   : > { %s354_s5 = sand.u32 1, %s2468_s22   ;;  %s356_s27 = sand.u32 1, %s2436_s14  }
  0x30   : > { %s1846_s4 = sshll.u32 %s356_s27, 3  ;;  %s1849_s18 = sshll.u32 %s3573_s28, 1 }
  0x31   : > { %s368_s3 = sadd.s32 %s1849_s18, %s2656_s24  ;;  %s358_s6 = scalar_lea.vmem [#allocation5], %s1846_s4 }
  0x32   : > { %s371_s13 = sshll.u32 %s358_s6, 4  ;;  %s1851_s2 = sshll.u32 %s368_s3, 6  ;;  %s2661_s13 = int_to_ptr.vmem [resolvable:$true] %s371_s13 }
  0x33   : > { %s3500_s1 = sld [smem:[#allocation26_spill]]  ;;  %p2672_p3 = pnand %p3463_p0, %p2637_p9 }
  0x34   : > { %s2678_s3 = scalar_lea.sflag [#allocation6], %s354_s5 }
  0x35   : > { %p2226_p8 = pneg %p2672_p3 }
  0x39   : > { %s2666_s7 = scalar_lea.hbm %s3500_s1, %s1851_s2  ;;  %s2229_s9 = scalar_lea.hbm %s3500_s1, 4096 }
  0x3a   : > { %s2224_s4 = scalar_lea.hbm %s2666_s7, 128  ;;  %p2230_p9 = scmp.lt.u32.totalorder %s2666_s7, %s3500_s1 }
  0x3b   : > { %p2225_p7 = scmp.ne.s32.totalorder %s2666_s7, %s2224_s4  ;;  %p2231_p12 = scmp.lt.u32.totalorder %s2229_s9, %s2224_s4 }
  0x3c   : > { %p2233_p2 = scmp.lt.u32.totalorder %s2224_s4, %s2666_s7 }
  0x3d   : > { %p2227_p10 = pnand %p2226_p8, %p2225_p7  ;;  %p2232_p0 = por %p2231_p12, %p2230_p9 }
  0x3f   : > { %p2228_p13 = pneg %p2227_p10  ;;  %p2234_p1 = por %p2233_p2, %p2232_p0 }
  0x41   : > { %p2235_p6 = pnand %p2234_p1, %p2228_p13 }
  0x43   : > { %2238 = shalt.err (!%p2235_p6)
}
  0x44   : > { %s2239_s26 = scalar_lea.vmem %s2661_s13, 128  ;;  %s2470_s5 = smov [#allocation5]  }
  0x45   : > { %p2240_p7 = scmp.ne.s32.totalorder %s2661_s13, %s2239_s26  ;;  %s2244_s29 = sshll.u32 %s2470_s5, 4  ;;  %s2245_s29 = int_to_ptr.vmem [resolvable:$false] %s2244_s29 }
  0x46   : > { %s2246_s2 = scalar_lea.vmem %s2245_s29, 256  ;;  %p2247_p5 = scmp.lt.s32.totalorder %s2661_s13, %s2245_s29 }
  0x47   : > { %p2242_p10 = pnand %p2240_p7, %p2226_p8  ;;  %p2248_p12 = scmp.lt.s32.totalorder %s2246_s2, %s2239_s26 }
  0x49   : > { %p2243_p4 = pneg %p2242_p10  ;;  %p2249_p9 = por %p2248_p12, %p2247_p5 }
  0x4b   : > { %p2250_p2 = pnand %p2249_p9, %p2243_p4 }
  0x4d   : > { %2253 = shalt.err (!%p2250_p2)
}
  0x4e   : > { %s3466_s4 = smov 64   ;;  %s3468_s6 = smov 4  }
  0x4f   : > { %2071 = dma.hbm_to_vmem [thread:$0]  (!%p2672_p3), %s2666_s7, 128, %s2661_s13, %s2678_s3, %s3466_s4, %s3466_s4, %s3468_s6  }
  0x50   : > { %p3502_p1 = scmp.lt.s32.totalorder %s2468_s22, 5  ;;  %p3503_p6 = scmp.ge.s32.totalorder %s2468_s22, 1 }
  0x51   : > { %s1832_s18 = sadd.s32 4294967294, %s2468_s22   ;;  %s49_s28 = sadd.s32 1, %s2448_s17 }
  0x52   : > { %p2713_p13 = pnand %p3503_p6, %p3502_p1  ;;  %p3505_p0 = scmp.eq.s32.totalorder %s2624_s8, 0 }
  0x53   : > { %p56_p4 = scmp.ne.s32.totalorder %s2448_s17, %s2444_s16  ;;  %p62_p5 = scmp.ne.s32.totalorder %s2444_s16, %s2440_s15 }
  0x54   : > { %s2722_s26 = scalar_select %p3505_p0, %s2448_s17, %s49_s28  }
  0x55   : > { %p286_p8 = scmp.eq.s32.totalorder %s2604_s23, 3  ;;  %p292_p7 = scmp.eq.s32.totalorder %s1832_s18, 3 }
  0x56   : > { %3506 = sst [smem:[#allocation24_spill]] %s2722_s26  ;;  %p3507_p10 = scmp.eq.s32.totalorder %s2468_s22, 0 }
  0x57   : > { %p3509_p3 = scmp.eq.s32.totalorder %s2604_s23, 0  ;;  %p2741_p2 = por %p286_p8, %p56_p4 }
  0x58   : > { %p2731_p12 = por %p3507_p10, %p56_p4  ;;  %p2745_p1 = por %p292_p7, %p62_p5 }
  0x59   : > { %p2737_p9 = por %p3509_p3, %p62_p5  ;;  %s330_s5 = sand.u32 1, %s2448_s17  }
  0x5a   : > { %s3511_s8 = scalar_select %p2741_p2, 1, 0 }
  0x5b   : > { %s3510_s7 = scalar_select %p2737_p9, 1, 0 }
  0x5c   : > { %s3512_s27 = scalar_select %p2745_p1, 1, 0 }
  0x5d   : > { %s1932_s29 = sshll.u32 %s2460_s20, 4  ;;  %s1841_s2 = sshll.u32 %s330_s5, 6 }
  0x5e   : > { %s341_s18 = sadd.s32 %s1932_s29, %s2656_s24  ;;  %s334_s4 = scalar_lea.vmem [#allocation2], %s1841_s2 }
  0x5f   : > { %s1845_s28 = sshll.u32 %s341_s18, 6  ;;  %s344_s6 = sshll.u32 %s334_s4, 4  ;;  %s2757_s6 = int_to_ptr.vmem [resolvable:$true] %s344_s6 }
  0x60   : > { %s3513_s0 = sld [smem:[#allocation25_spill]]  ;;  %p3514_p6 = scmp.lt.s32.totalorder %s2468_s22, 4 }
  0x61   : > { %s2767_s4 = scalar_lea.sflag [#allocation3], %s330_s5 }
  0x62   : > { %p2763_p0 = pnand %p3514_p6, %p2731_p12 }
  0x64   : > { %p2256_p5 = pneg %p2763_p0 }
  0x66   : > { %s2755_s26 = scalar_lea.hbm %s3513_s0, %s1845_s28  ;;  %s2259_s13 = scalar_lea.hbm %s3513_s0, 4096 }
  0x67   : > { %s2254_s29 = scalar_lea.hbm %s2755_s26, 1024  ;;  %p2260_p10 = scmp.lt.u32.totalorder %s2755_s26, %s3513_s0 }
  0x68   : > { %p2255_p4 = scmp.ne.s32.totalorder %s2755_s26, %s2254_s29  ;;  %p2261_p12 = scmp.lt.u32.totalorder %s2259_s13, %s2254_s29 }
  0x69   : > { %p2263_p6 = scmp.lt.u32.totalorder %s2254_s29, %s2755_s26 }
  0x6a   : > { %p2257_p8 = pnand %p2256_p5, %p2255_p4  ;;  %p2262_p3 = por %p2261_p12, %p2260_p10 }
  0x6c   : > { %p2258_p7 = pneg %p2257_p8  ;;  %p2264_p1 = por %p2263_p6, %p2262_p3 }
  0x6e   : > { %p2265_p2 = pnand %p2264_p1, %p2258_p7 }
  0x70   : > { %2268 = shalt.err (!%p2265_p2)
}
  0x71   : > { %s2269_s5 = scalar_lea.vmem %s2757_s6, 1024  ;;  %s2473_s28 = smov [#allocation2]  }
  0x72   : > { %p2270_p4 = scmp.ne.s32.totalorder %s2757_s6, %s2269_s5  ;;  %s2274_s1 = sshll.u32 %s2473_s28, 4  ;;  %s2275_s1 = int_to_ptr.vmem [resolvable:$false] %s2274_s1 }
  0x73   : > { %s2276_s21 = scalar_lea.vmem %s2275_s1, 2048  ;;  %p2277_p9 = scmp.lt.s32.totalorder %s2757_s6, %s2275_s1 }
  0x74   : > { %p2272_p8 = pnand %p2270_p4, %p2256_p5  ;;  %p2278_p10 = scmp.lt.s32.totalorder %s2276_s21, %s2269_s5 }
  0x76   : > { %p2273_p11 = pneg %p2272_p8  ;;  %p2279_p12 = por %p2278_p10, %p2277_p9 }
  0x78   : > { %p2280_p3 = pnand %p2279_p12, %p2273_p11 }
  0x7a   : > { %2283 = shalt.err (!%p2280_p3)
}
  0x7b   : > { %s3516_s29 = smov 4   ;;  %s3517_s13 = smov 64  }
  0x7c   : > { %s3518_s2 = sld [smem:[#allocation21_spill]]  ;;  %p3519_p11 = scmp.lt.s32.totalorder %s2632_s25, 15 }
  0x7d   : > { %2068 = dma.hbm_to_vmem [thread:$0]  (!%p2763_p0), %s2755_s26, 1024, %s2757_s6, %s2767_s4, %s3517_s13, %s3517_s13, %s3516_s29  }
  0x7e   : > { %s3577_s25 = smov (!%p3519_p11, %s2632_s25), 15  ;;  %p3520_p9 = scmp.lt.s32.totalorder %s2648_s12, 15 }
  0x7f   : > { %s121_s20 = sadd.s32 1, %s2424_s11  ;;  %p128_p2 = scmp.ne.s32.totalorder %s2424_s11, %s2420_s10 }
  0x80   : > { %s3579_s12 = smov (!%p3520_p9, %s2648_s12), 15  ;;  %p134_p1 = scmp.ne.s32.totalorder %s2420_s10, %s2416_s30 }
  0x81   : > { %s117_s18 = ssub.s32 %s3577_s25, %s3579_s12  ;;  %p3521_p5 = scmp.eq.s32.totalorder %s2468_s22, 0 }
  0x82   : > { %s118_s5 = sor.u32 %s117_s18, %s3518_s2  ;;  %p3523_p4 = scmp.eq.s32.totalorder %s2604_s23, 0 }
  0x83   : > { %p2812_p7 = por %p128_p2, %p3521_p5  ;;  %p119_p6 = scmp.eq.s32.totalorder %s118_s5, 0 }
  0x84   : > { %p2818_p8 = por %p134_p1, %p3523_p4  ;;  %s383_s26 = sand.u32 1, %s2424_s11  }
  0x85   : > { %s1854_s4 = sshll.u32 %s3577_s25, 1  ;;  %s1852_s12 = sshll.u32 %s383_s26, 3 }
  0x86   : > { %s3524_s6 = scalar_select %p2818_p8, 1, 0 }
  0x87   : > { %s2824_s1 = scalar_select %p119_p6, %s2424_s11, %s121_s20  }
  0x88   : > { %s395_s21 = sadd.s32 %s1854_s4, %s2656_s24  ;;  %s3525_s0 = sld [smem:[#allocation27_spill]] }
  0x89   : > { %s1856_s30 = sshll.u32 %s395_s21, 6  ;;  %s385_s5 = scalar_lea.vmem [#allocation7], %s1852_s12 }
  0x8a   : > { %s398_s19 = sshll.u32 %s385_s5, 4  ;;  %p3526_p0 = scmp.lt.s32.totalorder %s2468_s22, 4  ;;  %s2832_s19 = int_to_ptr.vmem [resolvable:$true] %s398_s19 }
  0x8c   : > { %p2838_p10 = pnand %p3526_p0, %p2812_p7 }
  0x8e   : > { %s2830_s17 = scalar_lea.hbm %s3525_s0, %s1856_s30  ;;  %p2286_p3 = pneg %p2838_p10 }
  0x8f   : > { %s2284_s24 = scalar_lea.hbm %s2830_s17, 128  ;;  %s2289_s4 = scalar_lea.hbm %s3525_s0, 4096 }
  0x90   : > { %p2285_p12 = scmp.ne.s32.totalorder %s2830_s17, %s2284_s24  ;;  %p2290_p2 = scmp.lt.u32.totalorder %s2830_s17, %s3525_s0 }
  0x91   : > { %p2291_p1 = scmp.lt.u32.totalorder %s2289_s4, %s2284_s24  ;;  %p2293_p7 = scmp.lt.u32.totalorder %s2284_s24, %s2830_s17 }
  0x92   : > { %p2287_p11 = pnand %p2286_p3, %p2285_p12 }
  0x93   : > { %p2292_p5 = por %p2291_p1, %p2290_p2 }
  0x94   : > { %p2288_p9 = pneg %p2287_p11 }
  0x95   : > { %p2294_p6 = por %p2293_p7, %p2292_p5 }
  0x97   : > { %p2295_p4 = pnand %p2294_p6, %p2288_p9 }
  0x99   : > { %2298 = shalt.err (!%p2295_p4)
}
  0x9a   : > { %s2299_s21 = scalar_lea.vmem %s2832_s19, 128  ;;  %s2474_s30 = smov [#allocation7]  }
  0x9b   : > { %p2300_p0 = scmp.ne.s32.totalorder %s2832_s19, %s2299_s21  ;;  %s2304_s2 = sshll.u32 %s2474_s30, 4  ;;  %s2305_s2 = int_to_ptr.vmem [resolvable:$false] %s2304_s2 }
  0x9c   : > { %s2306_s18 = scalar_lea.vmem %s2305_s2, 256  ;;  %p2307_p8 = scmp.lt.s32.totalorder %s2832_s19, %s2305_s2 }
  0x9d   : > { %p2302_p12 = pnand %p2300_p0, %p2286_p3  ;;  %p2308_p2 = scmp.lt.s32.totalorder %s2306_s18, %s2299_s21 }
  0x9f   : > { %p2303_p11 = pneg %p2302_p12  ;;  %p2309_p1 = por %p2308_p2, %p2307_p8 }
  0xa1   : > { %p2310_p5 = pnand %p2309_p1, %p2303_p11 }
  0xa3   : > { %2313 = shalt.err (!%p2310_p5)
}
  0xa4   : > { %2074 = dma.hbm_to_vmem [thread:$0]  (!%p2838_p10), %s2830_s17, 128, %s2832_s19, %s2678_s3, %s3517_s13, %s3517_s13, %s3516_s29  }
  0xa5   : > { %410 = sbr.rel (%p2713_p13) target bundleno = 1184 (0x4a0), region = 56  ;;  %s2874_s5 = sand.u32 (!%p2713_p13), 1, %s2444_s16  }
  0xa6   : > { %s1858_s24 = sshll.u32 (!%p2713_p13), %s2874_s5, 6  ;;  %s413_s20 = scalar_lea.sflag (!%p2713_p13), [#allocation3], %s2874_s5 }
  0xa7   : > { %s2880_s25 = scalar_lea.vmem (!%p2713_p13), [#allocation2], %s1858_s24  ;;  %p3528_p8 = scmp.ne.s32.totalorder (!%p2713_p13), %s3510_s7, 0 }
  0xac   : > { %2399 = dma.done.wait (%p3528_p8), %s413_s20, 1024  }
  0xad   : > { %2401 = vsyncadd (%p3528_p8), %s413_s20, 4294966272  ;;  %s3529_s17 = sld [smem:[#allocation13_spill]]  ;;  %s3530_s19 = sld [smem:[#allocation22_spill]] }
  0xae   : > { %s421_s3 = sand.u32 1, %s2604_s23  }
  0xaf   : > { %s422_s13 = scalar_lea.sflag [#allocation6], %s421_s3 }
  0xb3   : > { %s423_s9 = sand.u32 1, %s3529_s17   ;;  %p3531_p13 = scmp.ne.s32.totalorder %s3530_s19, 0 }
  0xb4   : > { %s1859_s29 = sshll.u32 %s423_s9, 3 }
  0xb5   : > { %s425_s26 = scalar_lea.vmem [#allocation5], %s1859_s29 }
  0xb6   : > { %2403 = dma.done.wait (%p3531_p13), %s422_s13, 128  }
  0xb7   : > { %2405 = vsyncadd (%p3531_p13), %s422_s13, 4294967168  ;;  %s432_s4 = sand.u32 1, %s2420_s10   ;;  %p3532_p10 = scmp.ne.s32.totalorder %s3524_s6, 0 }
  0xb8   : > { %s1860_s28 = sshll.u32 %s432_s4, 3 }
  0xb9   : > { %s434_s12 = scalar_lea.vmem [#allocation7], %s1860_s28 }
  0xba   : > { %2407 = dma.done.wait (%p3532_p10), %s422_s13, 128  }
  0xbb   : > { %2409 = vsyncadd (%p3532_p10), %s422_s13, 4294967168  ;;  %v2475_v0 = vmov 0.0   ;;  %vm2476_vm0 = vmmov 0   ;;  %s3533_s21 = sld [smem:[#allocation28_spill]]  ;;  %v2902_v2 = vld [vmem:[%s2880_s25] sm:$0xff]   ;;  %vm561_vm1 = vcmask 130048  }
  0xbc   : > { %2003 = vmatprep.subr.bf16.mxu1 %v2475_v0  ;;  %2005 = vmatprep.mubr.msk.bf16.mxu1 %vm2476_vm0, %v2475_v0  ;;  %v2204_v3 = vld [vmem:[%s425_s26] sm:$0xff]   ;;  %v2908_v5 = vld [vmem:[%s2880_s25 + $0x10] sm:$0xff]   ;;  %s3534_s6 = sld [smem:[#allocation15_spill]]  ;;  %v2918_v6 = vld [vmem:[%s2880_s25 + $0x18] sm:$0xff]   ;;  %s3535_s20 = sld [smem:[#allocation29_spill]]  ;;  %vm1103_vm2 = vcmask 1045504  }
  0xbd   : > { %v2905_v4 = vld [vmem:[%s2880_s25 + $0x8] sm:$0xff]   ;;  %1987 = vmatprep.mubr.msk.bf16.mxu0 %vm561_vm1, %v2902_v2  ;;  %v2922_v7 = vld [vmem:[%s2880_s25 + $0x20] sm:$0xff]   ;;  %v2212_v8 = vld [vmem:[%s434_s12] sm:$0xff]   ;;  %s3536_s3 = sld [smem:[#allocation31_spill]]  ;;  %vm950_vm4 = vcmask 1047552   ;;  %s2477_s29 = smov 4  }
  0xbe   : > { %v2930_v9 = vld [vmem:[%s2880_s25 + $0x28] sm:$0xff]   ;;  %v505_v10 = vld [vmem:[%s2880_s25 + $0x30] sm:$0xff]   ;;  %v507_v11 = vld [vmem:[%s2880_s25 + $0x38] sm:$0xff]   ;;  %vm951_vm5 = vsmask.f32 7424  ;;  %s2478_s13 = smov 8  }
  0xbf   : > { %vm2974_vm6 = vmand %vm950_vm4, %vm951_vm5  ;;  %vm907_vm8 = vcmask 1040384   ;;  %vm908_vm9 = vsmask.f32 256  ;;  %vm1023_vm11 = vcmask 31744   ;;  %vm1054_vm12 = vcmask 64512   ;;  %s2479_s26 = smov 124  }
  0xc0   : > { %vm3084_vm10 = vmand %vm907_vm8, %vm908_vm9  ;;  %vm1082_vm13 = vcmask 97280   ;;  %s2480_s4 = smov 120   ;;  %s3543_s23 = sld [smem:[#allocation30_spill]]  ;;  %vm1445_vm14 = vcmask 1041408   ;;  %vm1658_vm15 = vcmask 125952  }
  0xc1   : > { %v2202_v1 = vld [vmem:[%s3533_s21] sm:$0xff]   ;;  %s3301_s17 = scalar_lea.vmem [#allocation8], %s1858_s24  ;;  %s3546_s24 = sld [smem:[#allocation16_spill]] }
  0xc2   : > { %1985 = vmatprep.subr.bf16.mxu0 %v2202_v1  ;;  %2004 = vmatpush3.bf16.msra.mxu1 %v2202_v1  ;;  %p699_p3 = scmp.eq.s32.totalorder %s3534_s6, 0  ;;  %v2213_v12 = vld [vmem:[%s3535_s20] sm:$0x3f]   ;;  %p758_p9 = scmp.eq.s32.totalorder %s3534_s6, 1 }
  0xc3   : > { %1986 = vmatpush3.bf16.msra.mxu0 %v2202_v1  ;;  %2009 = vmatprep.subr.bf16.mxu1 %v2475_v0  ;;  %v2945_v13 = vld [vmem:[%s3536_s3] ss:$0 sm:$0xff]  ;;  %v1105_v19 = vsel %vm1103_vm2, %v2213_v12, 0  ;;  %s3545_s20 = sld [smem:[#allocation33_spill]]  ;;  %s1951_s19 = sshll.u32 %s3534_s6, 4 }
  0xc4   : > { %s753_s30 = scalar_select %p699_p3, 1, 0 }
  0xc5   : > { %2006 = vmatmul.mubr.msk.bf16.vlgmr.msra.gmra.mrb[0].mxu1 %vm561_vm1, %v2204_v3  ;;  %s2956_s9 = scalar_select %p758_p9, 1, 0 }
  0xc6   : > { %1988 = vmatmul.mubr.msk.bf16.vlgmr.msra.gmra.mrb[0].mxu0 %vm561_vm1, %v2905_v4  ;;  %2010 = vmatpush3.bf16.msra.mxu1 %v2202_v1  ;;  %v754_v16 = vstv %s753_s30  ;;  %s3544_s30 = sld [smem:[#allocation32_spill]]  ;;  %s1692_s6 = sshll.u32 %s3301_s17, 4  ;;  %s3354_s6 = int_to_ptr.vmem [resolvable:$true] %s1692_s6 }
  0xc7   : > { %1991 = vmatprep.mubr.msk.bf16.mxu0 %vm561_vm1, %v2908_v5  ;;  %2011 = vmatprep.mubr.msk.bf16.mxu1 %vm2476_vm0, %v2475_v0  ;;  %vm755_vm3 = vcmp.eq.s32.totalorder %v754_v16, 1  ;;  %v813_v43 = vstv %s2956_s9  ;;  %s1924_s3 = sshll.u32 %s3546_s24, 5  ;;  %s1676_s12 = scalar_lea.sflag [#allocation4], %s2874_s5 }
  0xc8   : > { %2055 = vmatprep.subr.msk.bf16.mxu1 %vm1103_vm2, %v2213_v12  ;;  %vm2985_vm7 = vcmp.eq.s32.totalorder %v813_v43, 1  ;;  %p3548_p6 = scmp.ne.s32.totalorder %s3511_s8, 0  ;;  %s2481_s7 = smov [#allocation8]  }
  0xc9   : > { %s2318_s21 = sshll.u32 %s2481_s7, 4  ;;  %s2319_s21 = int_to_ptr.vmem [resolvable:$false] %s2318_s21 }
  0xca   : > { %p2321_p12 = scmp.lt.s32.totalorder %s3354_s6, %s2319_s21 }
  0xcd   : > { %2012 = vmatmul.mubr.msk.bf16.vlgmr.msra.gmra.mrb[4].mxu1 %vm561_vm1, %v2212_v8 }
  0xce   : > { %1992 = vmatmul.mubr.msk.bf16.gmra.mrb[4].mxu0 %vm561_vm1, %v2918_v6  ;;  %2016 = vmatpush3.bf16.msra.mxu1 %v1105_v19 }
  0xcf   : > { %1995 = vmatprep.mubr.msk.bf16.mxu0 %vm561_vm1, %v2922_v7 }
  0xd6   : > { %1996 = vmatmul.mubr.msk.bf16.gmra.mrb[8].mxu0 %vm561_vm1, %v2930_v9 }
  0xd7   : > { %1999 = vmatprep.mubr.msk.bf16.mxu0 %vm561_vm1, %v505_v10 }
  0xde   : > { %2000 = vmatmul.mubr.msk.bf16.gmra.mrb[12].mxu0 %vm561_vm1, %v507_v11 }
 0x198   : > { %v744_v14 = vpop.f32.mrb[0].mxu1 }
 0x199   : > { %v745_v15 = vadd.f32 %v2945_v13, %v744_v14  ;;  %v1989_v17 = vpop.f32.mrb[0].mxu0  ;;  %v2007_v18 = vpop.f32.mrb[1].mxu1 }
 0x19a   : > { %v629_v20 = vadd.f32 %v1989_v17, %v2945_v13  ;;  %v620_v21 = vpop.f32.mrb[1].mxu0  ;;  %v747_v22 = vpop.f32.mrb[2].mxu1 }
 0x19b   : > { %v751_v23 = vmax.f32 %v745_v15, 0.0  ;;  %v621_v24 = vadd.f32 %v2945_v13, %v620_v21  ;;  %v748_v25 = vadd.f32 %v2945_v13, %v747_v22  ;;  %v1990_v26 = vpop.f32.mrb[2].mxu0  ;;  %v2008_v27 = vpop.f32.mrb[3].mxu1 }
 0x19c   : > { %v685_v28 = vmax.f32 %v629_v20, 0.0  ;;  %v632_v29 = vadd.f32 %v1990_v26, %v2945_v13  ;;  %v623_v30 = vpop.f32.mrb[3].mxu0 }
 0x19d   : > { %v683_v31 = vmax.f32 %v621_v24, 0.0  ;;  %v752_v32 = vmax.f32 %v748_v25, 0.0  ;;  %v624_v33 = vadd.f32 %v2945_v13, %v623_v30  ;;  %v756_v35 = vsel %vm755_vm3, 0.0, %v751_v23 }
 0x19e   : > { %v686_v34 = vmax.f32 %v632_v29, 0.0 }
 0x19f   : > { %v757_v36 = vsel %vm755_vm3, 0.0, %v752_v32  ;;  %v684_v37 = vmax.f32 %v624_v33, 0.0 }
 0x1a0   : > { %v2958_v38 = vpack.c.bf16 %v686_v34, %v685_v28  ;;  %v817_v39 = vpack.c.bf16 %v757_v36, %v756_v35  ;;  %v803_v40 = vpop.f32.mrb[4].mxu1 }
 0x1a1   : > { %v2960_v41 = vpack.c.bf16 %v684_v37, %v683_v31  ;;  %v1993_v42 = vpop.f32.mrb[4].mxu0  ;;  %v2013_v44 = vpop.f32.mrb[5].mxu1  ;;  %v804_v55 = vadd.f32 %v2945_v13, %v803_v40 }
 0x1a2   : > { %v845_v45 = vshll.u32 %v2958_v38, 16  ;;  %v645_v46 = vadd.f32 %v1993_v42, %v2945_v13  ;;  %973 = vrot.lane.b32.xlu0 %v817_v39, %s2477_s29  ;;  %v636_v47 = vpop.f32.mrb[5].mxu0  ;;  %v828_v48 = vshrl.u32 %v817_v39, 16  ;;  %v831_v49 = vshll.u32 %v817_v39, 16  ;;  %v806_v50 = vpop.f32.mrb[6].mxu1 }
 0x1a3   : > { %v838_v51 = vshll.u32 %v2960_v41, 16  ;;  %v637_v52 = vadd.f32 %v2945_v13, %v636_v47  ;;  %v1994_v53 = vpop.f32.mrb[6].mxu0  ;;  %v835_v54 = vshrl.u32 %v2960_v41, 16  ;;  %v2014_v56 = vpop.f32.mrb[7].mxu1  ;;  %v842_v3 = vshrl.u32 %v2958_v38, 16 }
 0x1a4   : > { %v689_v57 = vmax.f32 %v645_v46, 0.0  ;;  %v648_v58 = vadd.f32 %v1994_v53, %v2945_v13  ;;  %v639_v59 = vpop.f32.mrb[7].mxu0  ;;  %v920_v60 = vrot.slane %v831_v49, 1  ;;  %v830_v61 = vrot.slane %v828_v48, 7 }
 0x1a5   : > { %v687_v62 = vmax.f32 %v637_v52, 0.0  ;;  %v640_v63 = vadd.f32 %v2945_v13, %v639_v59  ;;  %v922_v1 = vrot.slane %v838_v51, 1  ;;  %v924_v11 = vrot.slane %v845_v45, 1 }
 0x1a6   : > { %v690_v8 = vmax.f32 %v648_v58, 0.0  ;;  %975 = vrot.lane.b32.xlu0 %v2960_v41, %s2477_s29  ;;  %v921_v10 = vor.u32 %v920_v60, %v828_v48  ;;  %v810_v16 = vmax.f32 %v804_v55, 0.0  ;;  %v807_v17 = vadd.f32 %v2945_v13, %v806_v50 }
 0x1a7   : > { %v688_v14 = vmax.f32 %v640_v63, 0.0  ;;  %v923_v15 = vor.u32 %v922_v1, %v835_v54  ;;  %v925_v20 = vor.u32 %v924_v11, %v842_v3  ;;  %v2994_v21 = vor.u32 %v831_v49, %v830_v61 }
 0x1a8   : > { %v2990_v18 = vpack.c.bf16 %v690_v8, %v689_v57  ;;  %v953_v19 = vsel %vm2974_vm6, %v921_v10, 0  ;;  %v837_v24 = vrot.slane %v835_v54, 7  ;;  %v844_v25 = vrot.slane %v842_v3, 7 }
 0x1a9   : > { %v2996_v22 = vpack.c.bf16 %v688_v14, %v687_v62  ;;  %1003 = vrot.lane.b32.xlu1 %v953_v19, %s2478_s13  ;;  %v1997_v23 = vpop.f32.mrb[8].mxu0  ;;  %v811_v26 = vmax.f32 %v807_v17, 0.0  ;;  %v954_v30 = vsel %vm2974_vm6, %v923_v15, 0  ;;  %v815_v31 = vsel %vm2985_vm7, 0.0, %v810_v16 }
 0x1aa   : > { %v859_v27 = vshll.u32 %v2990_v18, 16  ;;  %977 = vrot.lane.b32.xlu0 %v2958_v38, %s2477_s29  ;;  %v661_v28 = vadd.f32 %v1997_v23, %v2945_v13  ;;  %v652_v29 = vpop.f32.mrb[9].mxu0  ;;  %v955_v35 = vsel %vm2974_vm6, %v925_v20, 0  ;;  %v856_v42 = vshrl.u32 %v2990_v18, 16 }
 0x1ab   : > { %v852_v32 = vshll.u32 %v2996_v22, 16  ;;  %v653_v33 = vadd.f32 %v2945_v13, %v652_v29  ;;  %v1998_v34 = vpop.f32.mrb[10].mxu0  ;;  %v816_v36 = vsel %vm2985_vm7, 0.0, %v811_v26  ;;  %v849_v47 = vshrl.u32 %v2996_v22, 16 }
 0x1ac   : > { %v693_v37 = vmax.f32 %v661_v28, 0.0  ;;  %v664_v39 = vadd.f32 %v1998_v34, %v2945_v13  ;;  %v655_v40 = vpop.f32.mrb[11].mxu0  ;;  %v928_v43 = vrot.slane %v859_v27, 1  ;;  %v3021_v52 = vpack.c.bf16 %v816_v36, %v815_v31 }
 0x1ad   : > { %v691_v44 = vmax.f32 %v653_v33, 0.0  ;;  %1005 = vrot.lane.b32.xlu1 %v954_v30, %s2478_s13  ;;  %v656_v46 = vadd.f32 %v2945_v13, %v655_v40  ;;  %v926_v48 = vrot.slane %v852_v32, 1  ;;  %v3025_v55 = vor.u32 %v838_v51, %v837_v24 }
 0x1ae   : > { %v694_v49 = vmax.f32 %v664_v39, 0.0  ;;  %1007 = vrot.lane.b32.xlu0 %v955_v35, %s2478_s13  ;;  %v929_v50 = vor.u32 %v928_v43, %v856_v42  ;;  %v3029_v56 = vor.u32 %v845_v45, %v844_v25  ;;  %v851_v60 = vrot.slane %v849_v47, 7 }
 0x1af   : > { %v692_v53 = vmax.f32 %v656_v46, 0.0  ;;  %v927_v54 = vor.u32 %v926_v48, %v849_v47  ;;  %v858_v61 = vrot.slane %v856_v42, 7  ;;  %v891_v51 = vshrl.u32 %v3021_v52, 16 }
 0x1b0   : > { %v823_v57 = vpack.c.bf16 %v694_v49, %v693_v37  ;;  %v957_v62 = vsel %vm2974_vm6, %v929_v50, 0  ;;  %v3046_v28 = vor.u32 %v852_v32, %v851_v60 }
 0x1b1   : > { %v822_v58 = vpack.c.bf16 %v692_v53, %v691_v44  ;;  %979 = vrot.lane.b32.xlu1 %v2996_v22, %s2477_s29  ;;  %v2001_v59 = vpop.f32.mrb[12].mxu0  ;;  %v956_v8 = vsel %vm2974_vm6, %v927_v54, 0  ;;  %v893_v17 = vrot.slane %v891_v51, 7  ;;  %v3050_v31 = vor.u32 %v859_v27, %v858_v61 }
 0x1b2   : > { %v873_v63 = vshll.u32 %v823_v57, 16  ;;  %981 = vrot.lane.b32.xlu0 %v2990_v18, %s2477_s29  ;;  %v677_v41 = vadd.f32 %v2001_v59, %v2945_v13  ;;  %v668_v38 = vpop.f32.mrb[13].mxu0  ;;  %v870_v45 = vshrl.u32 %v823_v57, 16 }
 0x1b3   : > { %v866_v1 = vshll.u32 %v822_v58, 16  ;;  %v669_v3 = vadd.f32 %v2945_v13, %v668_v38  ;;  %v2002_v10 = vpop.f32.mrb[14].mxu0  ;;  %v863_v11 = vshrl.u32 %v822_v58, 16 }
 0x1b4   : > { %v697_v12 = vmax.f32 %v677_v41, 0.0  ;;  %v680_v14 = vadd.f32 %v2002_v10, %v2945_v13  ;;  %v671_v15 = vpop.f32.mrb[15].mxu0  ;;  %v932_v16 = vrot.slane %v873_v63, 1  ;;  %v872_v25 = vrot.slane %v870_v45, 7 }
 0x1b5   : > { %v695_v19 = vmax.f32 %v669_v3, 0.0  ;;  %1009 = vrot.lane.b32.xlu1 %v956_v8, %s2478_s13  ;;  %v672_v20 = vadd.f32 %v2945_v13, %v671_v15  ;;  %v865_v22 = vrot.slane %v863_v11, 7  ;;  %v930_v23 = vrot.slane %v866_v1, 1 }
 0x1b6   : > { %v698_v24 = vmax.f32 %v680_v14, 0.0  ;;  %1011 = vrot.lane.b32.xlu0 %v957_v62, %s2478_s13  ;;  %v933_v26 = vor.u32 %v932_v16, %v870_v45  ;;  %v894_v13 = vshll.u32 %v3021_v52, 16  ;;  %v3059_v39 = vor.u32 %v873_v63, %v872_v25 }
 0x1b7   : > { %v696_v29 = vmax.f32 %v672_v20, 0.0  ;;  %v931_v30 = vor.u32 %v930_v23, %v863_v11  ;;  %v3052_v33 = vor.u32 %v866_v1, %v865_v22  ;;  %v910_v41 = vsel %vm3084_vm10, 0, %v2994_v21 }
 0x1b8   : > { %v825_v34 = vpack.c.bf16 %v698_v24, %v697_v12  ;;  %v3061_v18 = vor.u32 %v894_v13, %v893_v17  ;;  %v959_v40 = vsel %vm2974_vm6, %v933_v26, 0  ;;  %v912_v3 = vsel %vm3084_vm10, 0, %v3029_v56 }
 0x1b9   : > { %v824_v35 = vpack.c.bf16 %v696_v29, %v695_v19  ;;  %983 = vrot.lane.b32.xlu1 %v822_v58, %s2477_s29  ;;  %v958_v36 = vsel %vm2974_vm6, %v931_v30, 0  ;;  %v913_v15 = vsel %vm3084_vm10, 0, %v3046_v28  ;;  %v914_v16 = vsel %vm3084_vm10, 0, %v3050_v31 }
 0x1ba   : > { %v887_v37 = vshll.u32 %v825_v34, 16  ;;  %985 = vrot.lane.b32.xlu0 %v823_v57, %s2477_s29  ;;  %v884_v32 = vshrl.u32 %v825_v34, 16  ;;  %v938_v57 = vrot.slane %v894_v13, 1  ;;  %v915_v26 = vsel %vm3084_vm10, 0, %v3052_v33 }
 0x1bb   : > { %v880_v27 = vshll.u32 %v824_v35, 16  ;;  %v877_v42 = vshrl.u32 %v824_v35, 16  ;;  %v916_v29 = vsel %vm3084_vm10, 0, %v3059_v39 }
 0x1bc   : > { %v886_v43 = vrot.slane %v884_v32, 7  ;;  %v936_v44 = vrot.slane %v887_v37, 1  ;;  %v939_v59 = vor.u32 %v938_v57, %v891_v51  ;;  %v911_v51 = vsel %vm3084_vm10, 0, %v3025_v55 }
 0x1bd   : > { %1013 = vrot.lane.b32.xlu1 %v958_v36, %s2478_s13  ;;  %v879_v46 = vrot.slane %v877_v42, 7  ;;  %v934_v47 = vrot.slane %v880_v27, 1 }
 0x1be   : > { %1015 = vrot.lane.b32.xlu0 %v959_v40, %s2478_s13  ;;  %v3067_v48 = vor.u32 %v887_v37, %v886_v43  ;;  %v937_v50 = vor.u32 %v936_v44, %v884_v32  ;;  %v962_v60 = vsel %vm2974_vm6, %v939_v59, 0 }
 0x1bf   : > { %v935_v49 = vor.u32 %v934_v47, %v877_v42  ;;  %v3069_v53 = vor.u32 %v880_v27, %v879_v46  ;;  %v919_v47 = vsel %vm3084_vm10, 0, %v3061_v18 }
 0x1c0   : > { %v961_v58 = vsel %vm2974_vm6, %v937_v50, 0  ;;  %v918_v39 = vsel %vm3084_vm10, 0, %v3067_v48 }
 0x1c1   : > { %987 = vrot.lane.b32.xlu1 %v824_v35, %s2477_s29  ;;  %v960_v54 = vsel %vm2974_vm6, %v935_v49, 0  ;;  %v917_v37 = vsel %vm3084_vm10, 0, %v3069_v53 }
 0x1c2   : > { %989 = vrot.lane.b32.xlu0 %v825_v34, %s2477_s29 }
 0x1c5   : > { %1017 = vrot.lane.b32.xlu1 %v960_v54, %s2478_s13 }
 0x1c6   : > { %1019 = vrot.lane.b32.xlu0 %v961_v58, %s2478_s13 }
 0x1c9   : > { %991 = vrot.lane.b32.xlu1 %v3021_v52, %s2477_s29 }
 0x1cd   : > { %1021 = vrot.lane.b32.xlu1 %v962_v60, %s2478_s13 }
 0x214   : > { %v974_v61 = vpop.permute.xlu0 %973 }
 0x215   : > { %v1026_v0 = vsel %vm1023_vm11, %v910_v41, %v974_v61  ;;  %v1413_v61 = vld [vmem:[%s3543_s23] sm:$0x3]  ;;  %s2314_s23 = scalar_lea.vmem %s3354_s6, 1024 }
 0x216   : > { %2056 = vmatprep.subr.msk.bf16.mxu0 %vm1445_vm14, %v1413_v61  ;;  %p2315_p7 = scmp.ne.s32.totalorder %s3354_s6, %s2314_s23 }
 0x218   : > { %v976_v63 = vpop.permute.xlu0 %975  ;;  %p2316_p4 = pnand %p2315_p7, %p3548_p6 }
 0x219   : > { %v1029_v1 = vsel %vm1023_vm11, %v911_v51, %v976_v63  ;;  %v1447_v63 = vsel %vm1445_vm14, %v1413_v61, 0 }
 0x21a   : > { %2038 = vmatpush3.bf16.msra.mxu0 %v1447_v63  ;;  %p2317_p0 = pneg %p2316_p4 }
 0x21b   : > { %v1004_v52 = vpop.permute.xlu1 %1003 }
 0x21c   : > { %v1056_v38 = vsel %vm1054_vm12, %v1026_v0, %v1004_v52  ;;  %v978_v45 = vpop.permute.xlu0 %977 }
 0x21d   : > { %2017 = vmatprep.mubr.msk.bf16.mxu1 %vm1082_vm13, %v1056_v38  ;;  %v1032_v8 = vsel %vm1023_vm11, %v912_v3, %v978_v45 }
 0x21f   : > { %v1006_v21 = vpop.permute.xlu1 %1005 }
 0x220   : > { %v1058_v10 = vsel %vm1054_vm12, %v1029_v1, %v1006_v21  ;;  %v1008_v11 = vpop.permute.xlu0 %1007 }
 0x221   : > { %v1060_v12 = vsel %vm1054_vm12, %v1032_v8, %v1008_v11  ;;  %2018 = vmatmul.mubr.msk.bf16.vlgmr.msra.gmra.mrb[8].mxu1 %vm1082_vm13, %v1058_v10 }
 0x222   : > { %2021 = vmatprep.mubr.msk.bf16.mxu1 %vm1082_vm13, %v1060_v12 }
 0x223   : > { %v980_v14 = vpop.permute.xlu1 %979 }
 0x224   : > { %v982_v55 = vpop.permute.xlu0 %981  ;;  %v1035_v56 = vsel %vm1023_vm11, %v913_v15, %v980_v14 }
 0x225   : > { %v1038_v19 = vsel %vm1023_vm11, %v914_v16, %v982_v55 }
 0x227   : > { %v1010_v17 = vpop.permute.xlu1 %1009 }
 0x228   : > { %v1062_v20 = vsel %vm1054_vm12, %v1035_v56, %v1010_v17  ;;  %v1012_v22 = vpop.permute.xlu0 %1011 }
 0x229   : > { %v1064_v23 = vsel %vm1054_vm12, %v1038_v19, %v1012_v22  ;;  %2022 = vmatmul.mubr.msk.bf16.gmra.mrb[12].mxu1 %vm1082_vm13, %v1062_v20  ;;  %v3245_v20 = vld [vmem:[%s3544_s30] ss:$0 sm:$0xff]  ;;  %s2320_s30 = scalar_lea.vmem %s2319_s21, 2048 }
 0x22a   : > { %2025 = vmatprep.mubr.msk.bf16.mxu1 %vm1082_vm13, %v1064_v23  ;;  %p2322_p11 = scmp.lt.s32.totalorder %s2320_s30, %s2314_s23 }
 0x22b   : > { %v984_v24 = vpop.permute.xlu1 %983 }
 0x22c   : > { %v986_v25 = vpop.permute.xlu0 %985  ;;  %v1041_v28 = vsel %vm1023_vm11, %v915_v26, %v984_v24  ;;  %p2323_p2 = por %p2322_p11, %p2321_p12 }
 0x22d   : > { %v1044_v31 = vsel %vm1023_vm11, %v916_v29, %v986_v25 }
 0x22e   : > { %p2324_p1 = pnand %p2323_p2, %p2317_p0 }
 0x22f   : > { %v1014_v30 = vpop.permute.xlu1 %1013 }
 0x230   : > { %v1066_v34 = vsel %vm1054_vm12, %v1041_v28, %v1014_v30  ;;  %v1016_v13 = vpop.permute.xlu0 %1015 }
 0x231   : > { %v1068_v35 = vsel %vm1054_vm12, %v1044_v31, %v1016_v13  ;;  %2026 = vmatmul.mubr.msk.bf16.gmra.mrb[16].mxu1 %vm1082_vm13, %v1066_v34 }
 0x232   : > { %2029 = vmatprep.mubr.msk.bf16.mxu1 %vm1082_vm13, %v1068_v35 }
 0x233   : > { %v988_v36 = vpop.permute.xlu1 %987 }
 0x234   : > { %v990_v33 = vpop.permute.xlu0 %989  ;;  %v1047_v32 = vsel %vm1023_vm11, %v917_v37, %v988_v36 }
 0x235   : > { %v1050_v40 = vsel %vm1023_vm11, %v918_v39, %v990_v33 }
 0x237   : > { %v1018_v27 = vpop.permute.xlu1 %1017 }
 0x238   : > { %v1070_v42 = vsel %vm1054_vm12, %v1047_v32, %v1018_v27  ;;  %v1020_v43 = vpop.permute.xlu0 %1019 }
 0x239   : > { %v1072_v44 = vsel %vm1054_vm12, %v1050_v40, %v1020_v43  ;;  %2030 = vmatmul.mubr.msk.bf16.gmra.mrb[20].mxu1 %vm1082_vm13, %v1070_v42 }
 0x23a   : > { %2033 = vmatprep.mubr.msk.bf16.mxu1 %vm1082_vm13, %v1072_v44 }
 0x23b   : > { %v992_v46 = vpop.permute.xlu1 %991 }
 0x23c   : > { %v1053_v49 = vsel %vm1023_vm11, %v919_v47, %v992_v46 }
 0x23f   : > { %v1022_v48 = vpop.permute.xlu1 %1021 }
 0x240   : > { %v1074_v50 = vsel %vm1054_vm12, %v1053_v49, %v1022_v48 }
 0x241   : > { %2034 = vmatmul.mubr.msk.bf16.gmra.mrb[24].mxu1 %vm1082_vm13, %v1074_v50 }
 0x2f4   : > { %v3148_v53 = vpop.f32.mrb[8].mxu1 }
 0x2f5   : > { %1236 = vrot.lane.b32.xlu0 %v3148_v53, %s2479_s26  ;;  %v3152_v54 = vpop.f32.mrb[9].mxu1 }
 0x2f6   : > { %v3154_v57 = vpop.f32.mrb[10].mxu1 }
 0x2f7   : > { %1238 = vrot.lane.b32.xlu1 %v3154_v57, %s2479_s26  ;;  %v3158_v18 = vpop.f32.mrb[11].mxu1 }
 0x2fc   : > { %v3160_v58 = vpop.f32.mrb[12].mxu1 }
 0x2fd   : > { %1306 = vrot.lane.b32.xlu0 %v3160_v58, %s2480_s4  ;;  %v3164_v59 = vpop.f32.mrb[13].mxu1 }
 0x2fe   : > { %v3166_v60 = vpop.f32.mrb[14].mxu1 }
 0x2ff   : > { %1308 = vrot.lane.b32.xlu1 %v3166_v60, %s2480_s4  ;;  %v3173_v62 = vpop.f32.mrb[15].mxu1 }
 0x301   : > { %1244 = vrot.lane.b32.xlu0 %v3160_v58, %s2479_s26 }
 0x303   : > { %1246 = vrot.lane.b32.xlu1 %v3166_v60, %s2479_s26 }
 0x304   : > { %v3179_v41 = vpop.f32.mrb[16].mxu1 }
 0x305   : > { %1240 = vrot.lane.b32.xlu0 %v3164_v59, %s2479_s26  ;;  %v3183_v0 = vpop.f32.mrb[17].mxu1 }
 0x306   : > { %v3185_v52 = vpop.f32.mrb[18].mxu1 }
 0x307   : > { %1242 = vrot.lane.b32.xlu1 %v3173_v62, %s2479_s26  ;;  %v3189_v38 = vpop.f32.mrb[19].mxu1 }
 0x309   : > { %1302 = vrot.lane.b32.xlu0 %v3164_v59, %s2480_s4 }
 0x30b   : > { %1304 = vrot.lane.b32.xlu1 %v3173_v62, %s2480_s4 }
 0x30c   : > { %v3195_v45 = vpop.f32.mrb[20].mxu1 }
 0x30d   : > { %1314 = vrot.lane.b32.xlu0 %v3179_v41, %s2480_s4  ;;  %v3199_v51 = vpop.f32.mrb[21].mxu1 }
 0x30e   : > { %v3201_v1 = vpop.f32.mrb[22].mxu1 }
 0x30f   : > { %1316 = vrot.lane.b32.xlu1 %v3185_v52, %s2480_s4  ;;  %v3205_v3 = vpop.f32.mrb[23].mxu1 }
 0x311   : > { %1252 = vrot.lane.b32.xlu0 %v3179_v41, %s2479_s26 }
 0x313   : > { %1254 = vrot.lane.b32.xlu1 %v3185_v52, %s2479_s26 }
 0x314   : > { %v2035_v21 = vpop.f32.mrb[24].mxu1 }
 0x315   : > { %1248 = vrot.lane.b32.xlu0 %v3183_v0, %s2479_s26  ;;  %v1205_v8 = vpop.f32.mrb[25].mxu1 }
 0x316   : > { %v2036_v10 = vpop.f32.mrb[26].mxu1 }
 0x317   : > { %1250 = vrot.lane.b32.xlu1 %v3189_v38, %s2479_s26  ;;  %v1208_v11 = vpop.f32.mrb[27].mxu1 }
 0x319   : > { %1310 = vrot.lane.b32.xlu0 %v3183_v0, %s2480_s4 }
 0x31b   : > { %1312 = vrot.lane.b32.xlu1 %v3189_v38, %s2480_s4 }
 0x31d   : > { %1322 = vrot.lane.b32.xlu0 %v3195_v45, %s2480_s4 }
 0x31f   : > { %1324 = vrot.lane.b32.xlu1 %v3201_v1, %s2480_s4 }
 0x321   : > { %1260 = vrot.lane.b32.xlu0 %v3195_v45, %s2479_s26 }
 0x323   : > { %1262 = vrot.lane.b32.xlu1 %v3201_v1, %s2479_s26 }
 0x325   : > { %1256 = vrot.lane.b32.xlu0 %v3199_v51, %s2479_s26 }
 0x327   : > { %1258 = vrot.lane.b32.xlu1 %v3205_v3, %s2479_s26 }
 0x329   : > { %1318 = vrot.lane.b32.xlu0 %v3199_v51, %s2480_s4 }
 0x32b   : > { %1320 = vrot.lane.b32.xlu1 %v3205_v3, %s2480_s4 }
 0x32d   : > { %1264 = vrot.lane.b32.xlu0 %v1205_v8, %s2479_s26 }
 0x32f   : > { %1266 = vrot.lane.b32.xlu1 %v1208_v11, %s2479_s26 }
 0x331   : > { %1326 = vrot.lane.b32.xlu0 %v1205_v8, %s2480_s4 }
 0x333   : > { %1328 = vrot.lane.b32.xlu1 %v1208_v11, %s2480_s4 }
 0x335   : > { %1330 = vrot.lane.b32.xlu0 %v2035_v21, %s2480_s4 }
 0x337   : > { %1332 = vrot.lane.b32.xlu1 %v2036_v10, %s2480_s4  ;;  %s3547_s4 = sld [smem:[#allocation34_spill]] }
 0x367   : > { %v1237_v12 = vpop.permute.xlu0 %1236 }
 0x368   : > { %v1284_v23 = vadd.f32 %v1237_v12, %v3152_v54 }
 0x369   : > { %v1239_v14 = vpop.permute.xlu1 %1238 }
 0x36a   : > { %v1285_v28 = vadd.f32 %v1239_v14, %v3158_v18 }
 0x36f   : > { %v1307_v55 = vpop.permute.xlu0 %1306 }
 0x371   : > { %v1309_v15 = vpop.permute.xlu1 %1308 }
 0x373   : > { %v1245_v56 = vpop.permute.xlu0 %1244 }
 0x375   : > { %v1247_v16 = vpop.permute.xlu1 %1246 }
 0x376   : > { %v1289_v61 = vadd.f32 %v1247_v16, %v3173_v62 }
 0x377   : > { %v1241_v17 = vpop.permute.xlu0 %1240 }
 0x378   : > { %v1286_v19 = vadd.f32 %v3148_v53, %v1241_v17  ;;  %v1288_v53 = vadd.f32 %v1245_v56, %v3164_v59 }
 0x379   : > { %v1243_v22 = vpop.permute.xlu1 %1242 }
 0x37a   : > { %v1352_v24 = vadd.f32 %v1307_v55, %v1286_v19  ;;  %v1287_v25 = vadd.f32 %v3154_v57, %v1243_v22 }
 0x37b   : > { %v1303_v26 = vpop.permute.xlu0 %1302 }
 0x37c   : > { %v1375_v29 = vadd.f32 %v3245_v20, %v1352_v24  ;;  %v1353_v30 = vadd.f32 %v1309_v15, %v1287_v25  ;;  %v1350_v31 = vadd.f32 %v1303_v26, %v1284_v23 }
 0x37d   : > { %v1305_v34 = vpop.permute.xlu1 %1304 }
 0x37e   : > { %v1376_v13 = vadd.f32 %v3245_v20, %v1353_v30  ;;  %v1373_v35 = vadd.f32 %v3245_v20, %v1350_v31  ;;  %v1351_v36 = vadd.f32 %v1305_v34, %v1285_v28  ;;  %v1391_v37 = vmax.f32 %v1375_v29, 0.0 }
 0x37f   : > { %v1315_v33 = vpop.permute.xlu0 %1314 }
 0x380   : > { %v1392_v32 = vmax.f32 %v1376_v13, 0.0  ;;  %v1374_v39 = vadd.f32 %v3245_v20, %v1351_v36  ;;  %v1389_v42 = vmax.f32 %v1373_v35, 0.0 }
 0x381   : > { %v1317_v27 = vpop.permute.xlu1 %1316 }
 0x382   : > { %v1406_v40 = vpack.c.bf16 %v1392_v32, %v1391_v37  ;;  %v1390_v43 = vmax.f32 %v1374_v39, 0.0 }
 0x383   : > { %v1253_v44 = vpop.permute.xlu0 %1252 }
 0x384   : > { %v1405_v46 = vpack.c.bf16 %v1390_v43, %v1389_v42  ;;  %v1292_v26 = vadd.f32 %v1253_v44, %v3183_v0 }
 0x385   : > { %v1255_v47 = vpop.permute.xlu1 %1254 }
 0x386   : > { %2039 = vmatprep.mubr.msk.bf16.mxu0 %vm1023_vm11, %v1405_v46  ;;  %v1293_v31 = vadd.f32 %v1255_v47, %v3189_v38 }
 0x387   : > { %2040 = vmatmul.mubr.msk.bf16.vlgmr.msra.gmra.mrb[16].mxu0 %vm1023_vm11, %v1406_v40  ;;  %v1249_v49 = vpop.permute.xlu0 %1248 }
 0x388   : > { %v1290_v48 = vadd.f32 %v3160_v58, %v1249_v49 }
 0x389   : > { %v1251_v50 = vpop.permute.xlu1 %1250 }
 0x38a   : > { %v1356_v54 = vadd.f32 %v1315_v33, %v1290_v48  ;;  %v1291_v57 = vadd.f32 %v3166_v60, %v1251_v50 }
 0x38b   : > { %v1311_v18 = vpop.permute.xlu0 %1310 }
 0x38c   : > { %v1379_v63 = vadd.f32 %v3245_v20, %v1356_v54  ;;  %v1357_v21 = vadd.f32 %v1317_v27, %v1291_v57  ;;  %v1354_v8 = vadd.f32 %v1311_v18, %v1288_v53 }
 0x38d   : > { %v1313_v10 = vpop.permute.xlu1 %1312 }
 0x38e   : > { %v1380_v11 = vadd.f32 %v3245_v20, %v1357_v21  ;;  %v1377_v12 = vadd.f32 %v3245_v20, %v1354_v8  ;;  %v1355_v14 = vadd.f32 %v1313_v10, %v1289_v61  ;;  %v1395_v55 = vmax.f32 %v1379_v63, 0.0 }
 0x38f   : > { %v1323_v58 = vpop.permute.xlu0 %1322 }
 0x390   : > { %v1396_v15 = vmax.f32 %v1380_v11, 0.0  ;;  %v1378_v59 = vadd.f32 %v3245_v20, %v1355_v14  ;;  %v1393_v17 = vmax.f32 %v1377_v12, 0.0 }
 0x391   : > { %v1325_v56 = vpop.permute.xlu1 %1324 }
 0x392   : > { %v1408_v60 = vpack.c.bf16 %v1396_v15, %v1395_v55  ;;  %v1394_v19 = vmax.f32 %v1378_v59, 0.0  ;;  %v1548_v55 = vunpack.c.l.bf16 %v2905_v4  ;;  %v1546_v15 = vunpack.c.l.bf16 %v2902_v2 }
 0x393   : > { %v1261_v62 = vpop.permute.xlu0 %1260 }
 0x394   : > { %v1407_v16 = vpack.c.bf16 %v1394_v19, %v1393_v17  ;;  %v1547_v17 = vunpack.c.h.bf16 %v2902_v2 }
 0x395   : > { %v1263_v22 = vpop.permute.xlu1 %1262 }
 0x396   : > { %2043 = vmatprep.mubr.msk.bf16.mxu0 %vm1023_vm11, %v1407_v16  ;;  %v1297_v46 = vadd.f32 %v1263_v22, %v3205_v3 }
 0x397   : > { %2044 = vmatmul.mubr.msk.bf16.gmra.mrb[20].mxu0 %vm1023_vm11, %v1408_v60  ;;  %v1257_v23 = vpop.permute.xlu0 %1256  ;;  %v1549_v60 = vunpack.c.h.bf16 %v2905_v4 }
 0x398   : > { %v1294_v24 = vadd.f32 %v3179_v41, %v1257_v23 }
 0x399   : > { %v1259_v25 = vpop.permute.xlu1 %1258 }
 0x39a   : > { %v1360_v28 = vadd.f32 %v1323_v58, %v1294_v24  ;;  %v1295_v29 = vadd.f32 %v3185_v52, %v1259_v25  ;;  %v1296_v52 = vadd.f32 %v1261_v62, %v3199_v51 }
 0x39b   : > { %v1319_v30 = vpop.permute.xlu0 %1318 }
 0x39c   : > { %v1383_v34 = vadd.f32 %v3245_v20, %v1360_v28  ;;  %v1361_v13 = vadd.f32 %v1325_v56, %v1295_v29  ;;  %v1358_v35 = vadd.f32 %v1319_v30, %v1292_v26 }
 0x39d   : > { %v1321_v36 = vpop.permute.xlu1 %1320 }
 0x39e   : > { %v1384_v33 = vadd.f32 %v3245_v20, %v1361_v13  ;;  %v1381_v37 = vadd.f32 %v3245_v20, %v1358_v35  ;;  %v1359_v32 = vadd.f32 %v1321_v36, %v1293_v31  ;;  %v1399_v39 = vmax.f32 %v1383_v34, 0.0 }
 0x39f   : > { %v1265_v41 = vpop.permute.xlu0 %1264  ;;  %v1552_v36 = vunpack.c.l.bf16 %v2918_v6 }
 0x3a0   : > { %v1400_v27 = vmax.f32 %v1384_v33, 0.0  ;;  %v1382_v0 = vadd.f32 %v3245_v20, %v1359_v32  ;;  %v1397_v38 = vmax.f32 %v1381_v37, 0.0  ;;  %v1298_v50 = vadd.f32 %v3195_v45, %v1265_v41 }
 0x3a1   : > { %v1267_v40 = vpop.permute.xlu1 %1266  ;;  %v1550_v37 = vunpack.c.l.bf16 %v2908_v5 }
 0x3a2   : > { %v1410_v42 = vpack.c.bf16 %v1400_v27, %v1399_v39  ;;  %v1398_v43 = vmax.f32 %v1382_v0, 0.0  ;;  %v1299_v51 = vadd.f32 %v3201_v1, %v1267_v40  ;;  %v3289_v1 = vld [vmem:[%s3545_s20] ss:$0 sm:$0xff]  ;;  %v1553_v39 = vunpack.c.h.bf16 %v2918_v6 }
 0x3a3   : > { %v1327_v44 = vpop.permute.xlu0 %1326  ;;  %v1551_v40 = vunpack.c.h.bf16 %v2908_v5 }
 0x3a4   : > { %v1409_v47 = vpack.c.bf16 %v1398_v43, %v1397_v38  ;;  %v1362_v49 = vadd.f32 %v1327_v44, %v1296_v52 }
 0x3a5   : > { %v1329_v48 = vpop.permute.xlu1 %1328 }
 0x3a6   : > { %v1385_v53 = vadd.f32 %v3245_v20, %v1362_v49  ;;  %v1363_v54 = vadd.f32 %v1329_v48, %v1297_v46  ;;  %2047 = vmatprep.mubr.msk.bf16.mxu0 %vm1023_vm11, %v1409_v47 }
 0x3a7   : > { %2048 = vmatmul.mubr.msk.bf16.gmra.mrb[24].mxu0 %vm1023_vm11, %v1410_v42  ;;  %v1331_v57 = vpop.permute.xlu0 %1330 }
 0x3a8   : > { %v1386_v18 = vadd.f32 %v3245_v20, %v1363_v54  ;;  %v1364_v61 = vadd.f32 %v1331_v57, %v1298_v50  ;;  %v1401_v3 = vmax.f32 %v1385_v53, 0.0 }
 0x3a9   : > { %v1333_v63 = vpop.permute.xlu1 %1332 }
 0x3aa   : > { %v1402_v21 = vmax.f32 %v1386_v18, 0.0  ;;  %v1387_v8 = vadd.f32 %v3245_v20, %v1364_v61  ;;  %v1365_v10 = vadd.f32 %v1333_v63, %v1299_v51  ;;  %v1556_v51 = vunpack.c.l.bf16 %v2930_v9 }
 0x3ab   : > { %v1554_v61 = vunpack.c.l.bf16 %v2922_v7 }
 0x3ac   : > { %v1411_v45 = vpack.c.bf16 %v1402_v21, %v1401_v3  ;;  %v1388_v11 = vadd.f32 %v3245_v20, %v1365_v10  ;;  %v1403_v12 = vmax.f32 %v1387_v8, 0.0  ;;  %v1557_v21 = vunpack.c.h.bf16 %v2930_v9 }
 0x3ae   : > { %v1404_v14 = vmax.f32 %v1388_v11, 0.0  ;;  %2051 = vmatprep.mubr.msk.bf16.mxu0 %vm1023_vm11, %v1411_v45  ;;  %v1555_v45 = vunpack.c.h.bf16 %v2922_v7 }
 0x3b0   : > { %v1412_v58 = vpack.c.bf16 %v1404_v14, %v1403_v12 }
 0x3b2   : > { %2052 = vmatmul.mubr.msk.bf16.gmra.mrb[28].mxu0 %vm1023_vm11, %v1412_v58 }
 0x45a   : > { %v2041_v59 = vpop.f32.mrb[16].mxu0 }
 0x45b   : > { %v1492_v56 = vadd.f32 %v2041_v59, %v3289_v1  ;;  %v1483_v20 = vpop.f32.mrb[17].mxu0 }
 0x45c   : > { %v1484_v19 = vadd.f32 %v3289_v1, %v1483_v20  ;;  %v2042_v62 = vpop.f32.mrb[18].mxu0 }
 0x45d   : > { %v1564_v16 = vadd.f32 %v1548_v55, %v1492_v56  ;;  %v1495_v22 = vadd.f32 %v2042_v62, %v3289_v1  ;;  %v1486_v23 = vpop.f32.mrb[19].mxu0 }
 0x45e   : > { %v1562_v24 = vadd.f32 %v1546_v15, %v1484_v19  ;;  %v1487_v25 = vadd.f32 %v3289_v1, %v1486_v23 }
 0x45f   : > { %v1580_v26 = vmax.f32 %v1564_v16, 0.0  ;;  %v1565_v28 = vadd.f32 %v1549_v60, %v1495_v22  ;;  %v2222_v16 = vld [vmem:[%s2880_s25 + $0x38] sm:$0xff]  }
 0x460   : > { %v1578_v29 = vmax.f32 %v1562_v24, 0.0  ;;  %v1563_v30 = vadd.f32 %v1547_v17, %v1487_v25  ;;  %v1560_v22 = vunpack.c.l.bf16 %v2222_v16  ;;  %v2223_v24 = vld [vmem:[%s2880_s25 + $0x30] sm:$0xff]   ;;  %s1689_s25 = sadd.s32 %s1951_s19, %s1924_s3 }
 0x461   : > { %v1937_v31 = vpack.c.bf16 %v1580_v26, %v1580_v26  ;;  %v1581_v4 = vmax.f32 %v1565_v28, 0.0  ;;  %v1558_v25 = vunpack.c.l.bf16 %v2223_v24  ;;  %s1925_s9 = sshll.u32 %s1689_s25, 6 }
 0x462   : > { %v1935_v34 = vpack.c.bf16 %v1578_v29, %v1578_v29  ;;  %v1579_v2 = vmax.f32 %v1563_v30, 0.0  ;;  %v1561_v29 = vunpack.c.h.bf16 %v2222_v16  ;;  %s3361_s28 = scalar_lea.hbm %s3547_s4, %s1925_s9 }
 0x463   : > { %1661 = vst.msk [vmem:[%s3301_s17 + $0x8] sm:$0xf] %vm1658_vm15, %v1937_v31  ;;  %v1938_v13 = vpack.c.bf16 %v1581_v4, %v1581_v4  ;;  %v1559_v4 = vunpack.c.h.bf16 %v2223_v24 }
 0x464   : > { %1659 = vst.msk [vmem:[%s3301_s17] sm:$0xf] %vm1658_vm15, %v1935_v34  ;;  %v1936_v35 = vpack.c.bf16 %v1579_v2, %v1579_v2 }
 0x465   : > { %1662 = vst.msk [vmem:[%s3301_s17 + $0xc] sm:$0xf] %vm1658_vm15, %v1938_v13 }
 0x466   : > { %1660 = vst.msk [vmem:[%s3301_s17 + $0x4] sm:$0xf] %vm1658_vm15, %v1936_v35 }
 0x46a   : > { %v2045_v33 = vpop.f32.mrb[20].mxu0 }
 0x46b   : > { %v1508_v32 = vadd.f32 %v2045_v33, %v3289_v1  ;;  %v1499_v41 = vpop.f32.mrb[21].mxu0 }
 0x46c   : > { %v1500_v27 = vadd.f32 %v3289_v1, %v1499_v41  ;;  %v2046_v0 = vpop.f32.mrb[22].mxu0 }
 0x46d   : > { %v1568_v52 = vadd.f32 %v1552_v36, %v1508_v32  ;;  %v1511_v42 = vadd.f32 %v2046_v0, %v3289_v1  ;;  %v1502_v38 = vpop.f32.mrb[23].mxu0 }
 0x46e   : > { %v1566_v43 = vadd.f32 %v1550_v37, %v1500_v27  ;;  %v1503_v44 = vadd.f32 %v3289_v1, %v1502_v38 }
 0x46f   : > { %v1584_v46 = vmax.f32 %v1568_v52, 0.0  ;;  %v1569_v47 = vadd.f32 %v1553_v39, %v1511_v42 }
 0x470   : > { %v1582_v49 = vmax.f32 %v1566_v43, 0.0  ;;  %v1567_v6 = vadd.f32 %v1551_v40, %v1503_v44 }
 0x471   : > { %v1941_v48 = vpack.c.bf16 %v1584_v46, %v1584_v46  ;;  %v1585_v50 = vmax.f32 %v1569_v47, 0.0 }
 0x472   : > { %v1939_v53 = vpack.c.bf16 %v1582_v49, %v1582_v49  ;;  %v1583_v54 = vmax.f32 %v1567_v6, 0.0 }
 0x473   : > { %1665 = vst.msk [vmem:[%s3301_s17 + $0x18] sm:$0xf] %vm1658_vm15, %v1941_v48  ;;  %v1942_v5 = vpack.c.bf16 %v1585_v50, %v1585_v50 }
 0x474   : > { %1663 = vst.msk [vmem:[%s3301_s17 + $0x10] sm:$0xf] %vm1658_vm15, %v1939_v53  ;;  %v1940_v57 = vpack.c.bf16 %v1583_v54, %v1583_v54 }
 0x475   : > { %1666 = vst.msk [vmem:[%s3301_s17 + $0x1c] sm:$0xf] %vm1658_vm15, %v1942_v5 }
 0x476   : > { %1664 = vst.msk [vmem:[%s3301_s17 + $0x14] sm:$0xf] %vm1658_vm15, %v1940_v57 }
 0x47a   : > { %v2049_v18 = vpop.f32.mrb[24].mxu0 }
 0x47b   : > { %v1524_v63 = vadd.f32 %v2049_v18, %v3289_v1  ;;  %v1515_v3 = vpop.f32.mrb[25].mxu0 }
 0x47c   : > { %v1516_v8 = vadd.f32 %v3289_v1, %v1515_v3  ;;  %v2050_v10 = vpop.f32.mrb[26].mxu0 }
 0x47d   : > { %v1572_v11 = vadd.f32 %v1556_v51, %v1524_v63  ;;  %v1527_v12 = vadd.f32 %v2050_v10, %v3289_v1  ;;  %v1518_v14 = vpop.f32.mrb[27].mxu0 }
 0x47e   : > { %v1570_v58 = vadd.f32 %v1554_v61, %v1516_v8  ;;  %v1519_v55 = vadd.f32 %v3289_v1, %v1518_v14 }
 0x47f   : > { %v1588_v15 = vmax.f32 %v1572_v11, 0.0  ;;  %v1573_v59 = vadd.f32 %v1557_v21, %v1527_v12 }
 0x480   : > { %v1586_v9 = vmax.f32 %v1570_v58, 0.0  ;;  %v1571_v56 = vadd.f32 %v1555_v45, %v1519_v55 }
 0x481   : > { %v1945_v20 = vpack.c.bf16 %v1588_v15, %v1588_v15  ;;  %v1589_v60 = vmax.f32 %v1573_v59, 0.0 }
 0x482   : > { %v1943_v17 = vpack.c.bf16 %v1586_v9, %v1586_v9  ;;  %v1587_v7 = vmax.f32 %v1571_v56, 0.0 }
 0x483   : > { %1669 = vst.msk [vmem:[%s3301_s17 + $0x28] sm:$0xf] %vm1658_vm15, %v1945_v20  ;;  %v1946_v19 = vpack.c.bf16 %v1589_v60, %v1589_v60 }
 0x484   : > { %1667 = vst.msk [vmem:[%s3301_s17 + $0x20] sm:$0xf] %vm1658_vm15, %v1943_v17  ;;  %v1944_v62 = vpack.c.bf16 %v1587_v7, %v1587_v7 }
 0x485   : > { %1670 = vst.msk [vmem:[%s3301_s17 + $0x2c] sm:$0xf] %vm1658_vm15, %v1946_v19  ;;  %v2053_v23 = vpop.f32.mrb[28].mxu0 }
 0x486   : > { %1668 = vst.msk [vmem:[%s3301_s17 + $0x24] sm:$0xf] %vm1658_vm15, %v1944_v62  ;;  %v1540_v26 = vadd.f32 %v2053_v23, %v3289_v1  ;;  %v1531_v28 = vpop.f32.mrb[29].mxu0 }
 0x487   : > { %v1532_v30 = vadd.f32 %v3289_v1, %v1531_v28  ;;  %v2054_v31 = vpop.f32.mrb[30].mxu0 }
 0x488   : > { %v1576_v34 = vadd.f32 %v1560_v22, %v1540_v26  ;;  %v1543_v2 = vadd.f32 %v2054_v31, %v3289_v1  ;;  %v1534_v13 = vpop.f32.mrb[31].mxu0 }
 0x489   : > { %v1574_v35 = vadd.f32 %v1558_v25, %v1532_v30  ;;  %v1535_v36 = vadd.f32 %v3289_v1, %v1534_v13 }
 0x48a   : > { %v1592_v33 = vmax.f32 %v1576_v34, 0.0  ;;  %v1577_v37 = vadd.f32 %v1561_v29, %v1543_v2 }
 0x48b   : > { %v1590_v32 = vmax.f32 %v1574_v35, 0.0  ;;  %v1575_v41 = vadd.f32 %v1559_v4, %v1535_v36 }
 0x48c   : > { %v1949_v39 = vpack.c.bf16 %v1592_v33, %v1592_v33  ;;  %v1593_v27 = vmax.f32 %v1577_v37, 0.0 }
 0x48d   : > { %v1947_v0 = vpack.c.bf16 %v1590_v32, %v1590_v32  ;;  %v1591_v40 = vmax.f32 %v1575_v41, 0.0 }
 0x48e   : > { %1673 = vst.msk [vmem:[%s3301_s17 + $0x38] sm:$0xf] %vm1658_vm15, %v1949_v39  ;;  %v1950_v52 = vpack.c.bf16 %v1593_v27, %v1593_v27 }
 0x48f   : > { %1671 = vst.msk [vmem:[%s3301_s17 + $0x30] sm:$0xf] %vm1658_vm15, %v1947_v0  ;;  %v1948_v1 = vpack.c.bf16 %v1591_v40, %v1591_v40 }
 0x490   : > { %1674 = vst.msk [vmem:[%s3301_s17 + $0x3c] sm:$0xf] %vm1658_vm15, %v1950_v52 }
 0x491   : > { %1672 = vst.msk [vmem:[%s3301_s17 + $0x34] sm:$0xf] %vm1658_vm15, %v1948_v1 }
 0x492   : > { %2327 = shalt.err (!%p2324_p1)
}
 0x493   : > { %s2328_s2 = scalar_lea.hbm %s3361_s28, 1024  ;;  %s2332_s17 = scalar_lea.hbm %s3547_s4, 4096 }
 0x494   : > { %p2329_p5 = scmp.ne.s32.totalorder %s3361_s28, %s2328_s2  ;;  %p2333_p10 = scmp.lt.u32.totalorder %s3361_s28, %s3547_s4 }
 0x495   : > { %p2334_p3 = scmp.lt.u32.totalorder %s2332_s17, %s2328_s2  ;;  %p2336_p7 = scmp.lt.u32.totalorder %s2328_s2, %s3361_s28 }
 0x496   : > { %p2330_p8 = pnand %p2329_p5, %p3548_p6 }
 0x497   : > { %p2335_p9 = por %p2334_p3, %p2333_p10 }
 0x498   : > { %p2331_p13 = pneg %p2330_p8 }
 0x499   : > { %p2337_p4 = por %p2336_p7, %p2335_p9 }
 0x49b   : > { %p2338_p0 = pnand %p2337_p4, %p2331_p13 }
 0x49d   : > { %2341 = shalt.err (!%p2338_p0)
}
 0x49e   : > { %s2482_s3 = smov 64  }
 0x49f   : > { %2063 = dma.vmem_to_hbm [thread:$0]  (%p3548_p6), %s3354_s6, 1024, %s3361_s28, %s1676_s12, %s2482_s3, %s2482_s3, %s2477_s29  }
 0x4a0 PF: > { %p2080_p12 = scmp.ge.s32.totalorder %s2468_s22, 2  ;;  %s1707_s25 = sand.u32 1, %s2440_s15  }
 0x4a1   : > { %p3549_p11 = scmp.ne.s32.totalorder %s3512_s27, 0  ;;  %s1708_s9 = scalar_lea.sflag [#allocation4], %s1707_s25 }
 0x4a3   : > { %p2076_p2 = pnand %p2080_p12, %p3549_p11 }
 0x4a5   : > { %2411 = dma.done.wait (!%p2076_p2), %s1708_s9, 1024  }
 0x4a6   : > { %2413 = vsyncadd (!%p2076_p2), %s1708_s9, 4294966272  ;;  %s28_s22 = sadd.s32 1, %s2468_s22   ;;  %s3551_s12 = sld [smem:[#allocation13_spill]] }
 0x4a7   : > { %p3397_p1 = scmp.ge.s32.totalorder %s28_s22, 6   ;;  %s3552_s5 = sld [smem:[#allocation23_spill]] }
 0x4a8   : > { %s3553_s29 = sld [smem:[#allocation14_spill]]  ;;  %s3554_s17 = sld [smem:[#allocation24_spill]] }
 0x4a9   : > { %s3555_s18 = sld [smem:[#allocation17_spill]]  ;;  %s3556_s19 = sld [smem:[#allocation18_spill]] }
 0x4aa   : > { %s3557_s20 = sld [smem:[#allocation19_spill]]  ;;  %s3558_s21 = sld [smem:[#allocation20_spill]] }
 0x4ab   : > { %s3559_s30 = smov %s2420_s10  ;;  %s3560_s10 = smov %s2424_s11 }
 0x4ac   : > { %s3561_s11 = smov %s2824_s1  ;;  %s3562_s13 = smov %s2436_s14 }
 0x4ad   : > { %s3563_s14 = smov %s3552_s5  ;;  %s3564_s15 = smov %s2444_s16 }
 0x4ae   : > { %s3565_s16 = smov %s3553_s29  ;;  %27 = sbr.rel (!%p3397_p1) target bundleno = 23 (0x17), region = 125 }
 0x4b5   :  { %1713 = vsyncpa [#allocation3], 1 }
 0x4b6   :  { %1715 = vsyncpa [#allocation3 + $0x1], 1 }
 0x4b7   :  { %1716 = vsyncpa [#allocation6], 1 }
 0x4b8   :  { %1718 = vsyncpa [#allocation6 + $0x1], 1 }
 0x4b9   :  { %1719 = vsyncpa [#allocation4], 1 }
 0x4ba   :  { %1721 = vsyncpa [#allocation4 + $0x1], 1 }

</bundles_post_ra>
